<compile_context>
chip_gen: v7x
topology: tpu7x:2x2x1
jax: 0.10.0
libtpu: 0.0.40
codegen_flags: <defaults>
</compile_context>

<pallas_src>
import functools
from typing import NamedTuple

import jax
import jax.numpy as jnp
from jax.experimental import pallas as pl
from jax.experimental.pallas import tpu as pltpu


NEG_SLOPE = 0.2


def _lrelu(x):
    return jnp.where(x > 0, x, NEG_SLOPE * x)


def _round_up(x, m):
    return (x + m - 1) // m * m


def _pad2(a, rows, cols):
    r, c = a.shape
    return jnp.pad(a, ((0, rows - r), (0, cols - c)))


def _as_row(b):
    return b.reshape(1, -1)


# ----------------------------------------------------------------------------
# One-time parameter preparation (pad to 128-lane multiples, pack, cast).
# ----------------------------------------------------------------------------
class PreparedParams(NamedTuple):
    w1: jax.Array      # [Up, Hp]
    wh: jax.Array      # [Hp, 4*Hp]   = [w2 | w3 | d2 | d3]
    whead: jax.Array   # [Hp, 2*Zp]   = [wmu | wlv]
    d1: jax.Array      # [Zp, Hp]
    d4: jax.Array      # [Hp, Up]
    bias: jax.Array    # [1, 3*Hp + 2*Zp + 3*Hp + Up]  (f32)
    U: int
    Z: int
    H: int
    Up: int
    Zp: int
    Hp: int


def prepare_params(params, *, compute_dtype=jnp.bfloat16):
    """Pad/pack/cast the 9 (W [in,out], b [1,out]) pairs once; reuse across calls."""
    (w1, b1), (w2, b2), (w3, b3), (wmu, bmu), (wlv, blv), \
        (d1, db1), (d2, db2), (d3, db3), (d4, db4) = params

    U, H = w1.shape
    Z = wmu.shape[1]
    cdt = jnp.dtype(compute_dtype)
    f32 = jnp.float32

    Up = _round_up(U, 128)
    Zp = _round_up(Z, 128)
    Hp = _round_up(H, 128)

    w1_p = _pad2(w1, Up, Hp).astype(cdt)                       # [Up, Hp]
    wh_p = jnp.concatenate(                                    # [Hp, 4*Hp]
        [_pad2(w2, Hp, Hp), _pad2(w3, Hp, Hp),
         _pad2(d2, Hp, Hp), _pad2(d3, Hp, Hp)], axis=1).astype(cdt)
    whead_p = jnp.concatenate(                                 # [Hp, 2*Zp]
        [_pad2(wmu, Hp, Zp), _pad2(wlv, Hp, Zp)], axis=1).astype(cdt)
    d1_p = _pad2(d1, Zp, Hp).astype(cdt)                       # [Zp, Hp]
    d4_p = _pad2(d4, Hp, Up).astype(cdt)                       # [Hp, Up]
    bias_p = jnp.concatenate(                                  # [1, 6Hp+2Zp+Up]
        [_pad2(_as_row(b1), 1, Hp), _pad2(_as_row(b2), 1, Hp),
         _pad2(_as_row(b3), 1, Hp),
         _pad2(_as_row(bmu), 1, Zp), _pad2(_as_row(blv), 1, Zp),
         _pad2(_as_row(db1), 1, Hp), _pad2(_as_row(db2), 1, Hp),
         _pad2(_as_row(db3), 1, Hp), _pad2(_as_row(db4), 1, Up)],
        axis=1).astype(f32)

    return PreparedParams(w1_p, wh_p, whead_p, d1_p, d4_p, bias_p,
                          U, Z, H, Up, Zp, Hp)


# ----------------------------------------------------------------------------
# Kernel
# ----------------------------------------------------------------------------
def _conditional_prior_kernel(
    # batched packed activation slab [TB, Up+Zp] = [u | eps], f32
    x_ref,
    # resident parameters
    w1_ref, wh_ref, whead_ref, d1_ref, d4_ref, b_ref,
    # packed output [TB, Up + 3*Zp] = [out | z | mu | logvar]
    pack_ref,
    *, H, Zp, Up,
):
    f32 = jnp.float32
    cdt = w1_ref.dtype  # compute dtype (bf16 or f32); accumulation always f32

    # ---- static slices of the packed bias row (128-aligned offsets) ----
    widths = (H, H, H, 2 * Zp, H, H, H, Up)
    offs = [0]
    for w in widths:
        offs.append(offs[-1] + w)
    b1 = b_ref[:, offs[0]:offs[1]]
    b2 = b_ref[:, offs[1]:offs[2]]
    b3 = b_ref[:, offs[2]:offs[3]]
    bhead = b_ref[:, offs[3]:offs[4]]
    db1 = b_ref[:, offs[4]:offs[5]]
    db2 = b_ref[:, offs[5]:offs[6]]
    db3 = b_ref[:, offs[6]:offs[7]]
    db4 = b_ref[:, offs[7]:offs[8]]

    # ---- split the single input slab (128-aligned static slices) ----
    u = x_ref[:, 0:Up].astype(cdt)
    eps = x_ref[:, Up:Up + Zp]                       # stays f32

    # ---- Encoder MLP (3 x Linear + LeakyReLU) ----
    h = _lrelu(jnp.dot(u, w1_ref[...], preferred_element_type=f32) + b1)
    h = _lrelu(jnp.dot(h.astype(cdt), wh_ref[:, 0:H],
                       preferred_element_type=f32) + b2)
    h = _lrelu(jnp.dot(h.astype(cdt), wh_ref[:, H:2 * H],
                       preferred_element_type=f32) + b3)

    # ---- Fused mu / logvar head: one [H, 2*Zp] matmul ----
    head = jnp.dot(h.astype(cdt), whead_ref[...],
                   preferred_element_type=f32) + bhead
    mu = head[:, :Zp]
    lv = head[:, Zp:]

    # ---- Reparametrize (f32): z = mu + exp(0.5 * logvar) * eps ----
    z = mu + jnp.exp(0.5 * lv) * eps

    # ---- Decoder MLP (3 x Linear + LeakyReLU, then Linear) ----
    g = _lrelu(jnp.dot(z.astype(cdt), d1_ref[...],
                       preferred_element_type=f32) + db1)
    g = _lrelu(jnp.dot(g.astype(cdt), wh_ref[:, 2 * H:3 * H],
                       preferred_element_type=f32) + db2)
    g = _lrelu(jnp.dot(g.astype(cdt), wh_ref[:, 3 * H:4 * H],
                       preferred_element_type=f32) + db3)
    out = jnp.dot(g.astype(cdt), d4_ref[...],
                  preferred_element_type=f32) + db4

    # ---- Lane-dense packed stores (offsets are multiples of 128) ----
    odt = pack_ref.dtype
    pack_ref[:, 0:Up] = out.astype(odt)
    pack_ref[:, Up:Up + Zp] = z.astype(odt)
    pack_ref[:, Up + Zp:Up + 2 * Zp] = mu.astype(odt)
    pack_ref[:, Up + 2 * Zp:Up + 3 * Zp] = lv.astype(odt)


# ----------------------------------------------------------------------------
# Wrapper
# ----------------------------------------------------------------------------
def _vmem_capacity_bytes():
    try:
        return int(pltpu.get_tpu_info().vmem_capacity_bytes)
    except Exception:
        return 64 << 20  # conservative default: v7x per-TensorCore VMEM


def conditional_prior_forward(u, eps, params, *,
                              compute_dtype=jnp.bfloat16,
                              out_dtype=jnp.float32,
                              block_b=1024):
    """Forward pass.

    params: either a PreparedParams (preferred: padding/packing done once), or
    the raw list of (W [in,out], b [1,out]) pairs in the order
    encoder(w1, w2, w3, wmu, wlv), decoder(d1, d2, d3, d4).
    compute_dtype is only used when raw params are passed.
    """
    if isinstance(params, PreparedParams):
        pp = params
    else:
        pp = prepare_params(params, compute_dtype=compute_dtype)

    B, U = u.shape
    Z = eps.shape[1]
    assert U == pp.U and Z == pp.Z, "shape mismatch vs prepared params"
    Up, Zp, Hp = pp.Up, pp.Zp, pp.Hp
    f32 = jnp.float32
    odt = jnp.dtype(out_dtype)

    # ---- Batch tiling: pad only to 8 rows, ragged grid (masked last block),
    #      and >= 2 grid steps whenever possible so both v7x TCs get work. ----
    Bp = _round_up(B, 8)
    TB = min(block_b, Bp)
    nsteps = pl.cdiv(Bp, TB)
    if Bp > 8:
        nsteps = max(nsteps, 2)
    TB = _round_up(pl.cdiv(Bp, nsteps), 8)
    grid = (pl.cdiv(Bp, TB),)

    # ---- Single packed activation slab [Bp, Up+Zp] = [u | eps] (f32) ----
    x = jnp.concatenate(
        [_pad2(u.astype(f32), Bp, Up), _pad2(eps.astype(f32), Bp, Zp)], axis=1)

    P = Up + 3 * Zp                           # packed output width
    BW = int(pp.bias.shape[1])

    kernel = functools.partial(_conditional_prior_kernel, H=Hp, Zp=Zp, Up=Up)

    batched = lambda i: (i, 0)                # new tile every grid step
    resident = lambda i: (0, 0)               # same block -> DMA'd once

    weight_bytes = sum(int(a.size) * a.dtype.itemsize
                       for a in (pp.w1, pp.wh, pp.whead, pp.d1, pp.d4, pp.bias))
    act_bytes = TB * (Up + Zp) * 4            # f32 input slab tile
    out_bytes = TB * P * odt.itemsize         # packed output tile
    interm_bytes = TB * (4 * Hp + 2 * Zp + Up) * 4
    vmem_cap = _vmem_capacity_bytes()

    def build(single_buffer_params):
        if single_buffer_params:
            res_kw = dict(pipeline_mode=pl.Buffered(1))  # weights: 1 buffer
            wmult = 1
        else:
            res_kw = {}
            wmult = 2
        in_specs = [
            pl.BlockSpec((TB, Up + Zp), batched),             # [u | eps] slab
            pl.BlockSpec((Up, Hp), resident, **res_kw),       # w1
            pl.BlockSpec((Hp, 4 * Hp), resident, **res_kw),   # [w2|w3|d2|d3]
            pl.BlockSpec((Hp, 2 * Zp), resident, **res_kw),   # [wmu|wlv]
            pl.BlockSpec((Zp, Hp), resident, **res_kw),       # d1
            pl.BlockSpec((Hp, Up), resident, **res_kw),       # d4
            pl.BlockSpec((1, BW), resident, **res_kw),        # packed biases
        ]
        out_specs = pl.BlockSpec((TB, P), batched)
        needed = (wmult * weight_bytes + 2 * (act_bytes + out_bytes)
                  + interm_bytes + (4 << 20))
        # Per-generation clamp: never request the whole physical VMEM
        # (v7x: 64 MiB total -> cap at 48 MiB; v5e/v6e: 128 MiB -> 112 MiB).
        vmem_limit = int(min(max(needed, 16 << 20),
                             max(vmem_cap - (16 << 20), 16 << 20)))
        return pl.pallas_call(
            kernel,
            grid=grid,
            in_specs=in_specs,
            out_specs=out_specs,
            out_shape=jax.ShapeDtypeStruct((Bp, P), odt),
            compiler_params=pltpu.CompilerParams(
                dimension_semantics=("parallel",),  # shard batch tiles (v7x 2 TCs)
                vmem_limit_bytes=vmem_limit,
            ),
        )

    args = (x, pp.w1, pp.wh, pp.whead, pp.d1, pp.d4, pp.bias)
    try:
        packed = build(True)(*args)
    except Exception:
        # pl.Buffered(1) not supported by this jax/libtpu: fall back to the
        # default pipeline (still correct, just double-buffers the weights).
        packed = build(False)(*args)

    out = packed[:B, :U]
    z = packed[:B, Up:Up + Z]
    mu = packed[:B, Up + Zp:Up + Zp + Z]
    logvar = packed[:B, Up + 2 * Zp:Up + 2 * Zp + Z]
    return out, z, mu, logvar


# ----------------------------------------------------------------------------
# Synthetic parameters + pure-JAX reference
# ----------------------------------------------------------------------------
def make_params(key, u_dim, hidden_dim, z_dim):
    """Deterministic synthetic parameters. Weights stored as [in, out]."""
    dims = [
        # encoder
        (u_dim, hidden_dim), (hidden_dim, hidden_dim), (hidden_dim, hidden_dim),
        (hidden_dim, z_dim), (hidden_dim, z_dim),
        # decoder
        (z_dim, hidden_dim), (hidden_dim, hidden_dim), (hidden_dim, hidden_dim),
        (hidden_dim, u_dim),
    ]
    params = []
    for i, (din, dout) in enumerate(dims):
        kw, kb = jax.random.split(jax.random.fold_in(key, i))
        scale = 1.0 / jnp.sqrt(jnp.float32(din))
        w = jax.random.normal(kw, (din, dout), jnp.float32) * scale
        b = jax.random.normal(kb, (1, dout), jnp.float32) * 0.01
        params.append((w, b))
    return params


def reference_forward(u, eps, params):
    """Pure-JAX reference for correctness checking."""
    (w1, b1), (w2, b2), (w3, b3), (wmu, bmu), (wlv, blv), \
        (d1, db1), (d2, db2), (d3, db3), (d4, db4) = params
    h = _lrelu(u @ w1 + b1)
    h = _lrelu(h @ w2 + b2)
    h = _lrelu(h @ w3 + b3)
    mu = h @ wmu + bmu
    lv = h @ wlv + blv
    z = mu + jnp.exp(0.5 * lv) * eps
    g = _lrelu(z @ d1 + db1)
    g = _lrelu(g @ d2 + db2)
    g = _lrelu(g @ d3 + db3)
    out = g @ d4 + db4
    return out, z, mu, lv


if __name__ == "__main__":
    # Small shapes consistent with the module (u_dim=16, hidden_dim=128, z_dim=16).
    # B=20 exercises the >=2-grid-step path and the ragged (masked) last block.
    B, U_DIM, HIDDEN, Z_DIM = 20, 16, 128, 16

    key = jax.random.PRNGKey(0)
    ku, keps, kp = jax.random.split(key, 3)

    u = jax.random.normal(ku, (B, U_DIM), jnp.float32)
    # TODO(synk): eps (torch.randn_like in reparametrize) is drawn in plain JAX
    # and passed in; the reparametrization math itself runs inside the kernel.
    eps = jax.random.normal(keps, (B, Z_DIM), jnp.float32)
    params = make_params(kp, U_DIM, HIDDEN, Z_DIM)

    ref = reference_forward(u, eps, params)

    # f32 compute, f32 out (v5e-friendly / tight-tolerance path).
    pp32 = prepare_params(params, compute_dtype=jnp.float32)
    res32 = conditional_prior_forward(u, eps, pp32, out_dtype=jnp.float32)
    jax.block_until_ready(res32)
    for got, want in zip(res32, ref):
        assert got.shape == want.shape
        assert jnp.allclose(got, want, atol=1e-3, rtol=1e-3), "f32 mismatch vs reference"

    # bf16 compute (default; MXU-friendly on all gens), f32 packed output.
    pp16 = prepare_params(params)  # default compute_dtype=bf16
    res16 = conditional_prior_forward(u, eps, pp16)
    jax.block_until_ready(res16)
    for got, want in zip(res16, ref):
        assert got.shape == want.shape
        assert jnp.allclose(got, want, atol=3e-1, rtol=3e-1), "bf16 mismatch vs reference"

    # bf16 compute + bf16 packed output (halves the dominant HBM writeback).
    res16o = conditional_prior_forward(u, eps, pp16, out_dtype=jnp.bfloat16)
    jax.block_until_ready(res16o)
    for got, want in zip(res16o, ref):
        assert got.shape == want.shape
        assert jnp.allclose(got.astype(jnp.float32), want, atol=3e-1, rtol=3e-1), \
            "bf16-out mismatch vs reference"

    print("KERNEL_OK")
</pallas_src>

<mosaic_0001>
module attributes {stable_mosaic.version = 11 : i64} {
  func.func @_conditional_prior_kernel(%arg0: i32, %arg1: memref<16x256xf32, #tpu.memory_space<vmem>>, %arg2: memref<128x128xf32, #tpu.memory_space<vmem>>, %arg3: memref<128x512xf32, #tpu.memory_space<vmem>>, %arg4: memref<128x256xf32, #tpu.memory_space<vmem>>, %arg5: memref<128x128xf32, #tpu.memory_space<vmem>>, %arg6: memref<128x128xf32, #tpu.memory_space<vmem>>, %arg7: memref<1x1152xf32, #tpu.memory_space<vmem>>, %arg8: memref<16x512xf32, #tpu.memory_space<vmem>>) attributes {dimension_semantics = [#tpu.dimension_semantics<parallel>], iteration_bounds = array<i64: 2>, scalar_prefetch = 0 : i64, scratch_operands = 0 : i64, tpu.core_type = #tpu.core_type<tc>, window_params = [{transform_indices = @transform_0, window_bounds = array<i64: 16, 256>}, {pipeline_mode = #tpu.pipeline_mode<synchronous>, transform_indices = @transform_1, window_bounds = array<i64: 128, 128>}, {pipeline_mode = #tpu.pipeline_mode<synchronous>, transform_indices = @transform_2, window_bounds = array<i64: 128, 512>}, {pipeline_mode = #tpu.pipeline_mode<synchronous>, transform_indices = @transform_3, window_bounds = array<i64: 128, 256>}, {pipeline_mode = #tpu.pipeline_mode<synchronous>, transform_indices = @transform_4, window_bounds = array<i64: 128, 128>}, {pipeline_mode = #tpu.pipeline_mode<synchronous>, transform_indices = @transform_5, window_bounds = array<i64: 128, 128>}, {pipeline_mode = #tpu.pipeline_mode<synchronous>, transform_indices = @transform_6, window_bounds = array<i64: 1, 1152>}, {transform_indices = @transform_7, window_bounds = array<i64: 16, 512>}]} {
    %c0 = arith.constant 0 : index
    %c0_0 = arith.constant 0 : index
    %0 = vector.load %arg7[%c0, %c0_0] : memref<1x1152xf32, #tpu.memory_space<vmem>>, vector<1x128xf32>
    %c0_1 = arith.constant 0 : index
    %c128 = arith.constant 128 : index
    %1 = vector.load %arg7[%c0_1, %c128] : memref<1x1152xf32, #tpu.memory_space<vmem>>, vector<1x128xf32>
    %c0_2 = arith.constant 0 : index
    %c256 = arith.constant 256 : index
    %2 = vector.load %arg7[%c0_2, %c256] : memref<1x1152xf32, #tpu.memory_space<vmem>>, vector<1x128xf32>
    %c0_3 = arith.constant 0 : index
    %c384 = arith.constant 384 : index
    %3 = vector.load %arg7[%c0_3, %c384] : memref<1x1152xf32, #tpu.memory_space<vmem>>, vector<1x256xf32>
    %c0_4 = arith.constant 0 : index
    %c640 = arith.constant 640 : index
    %4 = vector.load %arg7[%c0_4, %c640] : memref<1x1152xf32, #tpu.memory_space<vmem>>, vector<1x128xf32>
    %c0_5 = arith.constant 0 : index
    %c768 = arith.constant 768 : index
    %5 = vector.load %arg7[%c0_5, %c768] : memref<1x1152xf32, #tpu.memory_space<vmem>>, vector<1x128xf32>
    %c0_6 = arith.constant 0 : index
    %c896 = arith.constant 896 : index
    %6 = vector.load %arg7[%c0_6, %c896] : memref<1x1152xf32, #tpu.memory_space<vmem>>, vector<1x128xf32>
    %c0_7 = arith.constant 0 : index
    %c1024 = arith.constant 1024 : index
    %7 = vector.load %arg7[%c0_7, %c1024] : memref<1x1152xf32, #tpu.memory_space<vmem>>, vector<1x128xf32>
    %c0_8 = arith.constant 0 : index
    %c0_9 = arith.constant 0 : index
    %8 = vector.load %arg1[%c0_8, %c0_9] : memref<16x256xf32, #tpu.memory_space<vmem>>, vector<16x128xf32>
    %c0_10 = arith.constant 0 : index
    %c128_11 = arith.constant 128 : index
    %9 = vector.load %arg1[%c0_10, %c128_11] : memref<16x256xf32, #tpu.memory_space<vmem>>, vector<16x128xf32>
    %c0_12 = arith.constant 0 : index
    %c0_13 = arith.constant 0 : index
    %10 = vector.load %arg2[%c0_12, %c0_13] : memref<128x128xf32, #tpu.memory_space<vmem>>, vector<128x128xf32>
    %cst = arith.constant dense<0.000000e+00> : vector<16x128xf32>
    %11 = tpu.matmul %8, %10, %cst {dimension_numbers = #tpu.dot_dimension_numbers<[1], [0], [0], [1], [0, 0, 1, 1], [], []>} : vector<16x128xf32>, vector<128x128xf32>, vector<16x128xf32> -> vector<16x128xf32>
    %12 = vector.broadcast %0 : vector<1x128xf32> to vector<16x128xf32>
    %13 = arith.addf %11, %12 : vector<16x128xf32>
    %cst_14 = arith.constant 0.000000e+00 : f32
    %14 = vector.broadcast %cst_14 : f32 to vector<16x128xf32>
    %15 = arith.cmpf ogt, %13, %14 : vector<16x128xf32>
    %cst_15 = arith.constant 2.000000e-01 : f32
    %16 = vector.broadcast %cst_15 : f32 to vector<16x128xf32>
    %17 = arith.mulf %16, %13 : vector<16x128xf32>
    %18 = arith.select %15, %13, %17 : vector<16x128xi1>, vector<16x128xf32>
    %c0_16 = arith.constant 0 : index
    %c0_17 = arith.constant 0 : index
    %19 = vector.load %arg3[%c0_16, %c0_17] : memref<128x512xf32, #tpu.memory_space<vmem>>, vector<128x128xf32>
    %cst_18 = arith.constant dense<0.000000e+00> : vector<16x128xf32>
    %20 = tpu.matmul %18, %19, %cst_18 {dimension_numbers = #tpu.dot_dimension_numbers<[1], [0], [0], [1], [0, 0, 1, 1], [], []>} : vector<16x128xf32>, vector<128x128xf32>, vector<16x128xf32> -> vector<16x128xf32>
    %21 = vector.broadcast %1 : vector<1x128xf32> to vector<16x128xf32>
    %22 = arith.addf %20, %21 : vector<16x128xf32>
    %cst_19 = arith.constant 0.000000e+00 : f32
    %23 = vector.broadcast %cst_19 : f32 to vector<16x128xf32>
    %24 = arith.cmpf ogt, %22, %23 : vector<16x128xf32>
    %cst_20 = arith.constant 2.000000e-01 : f32
    %25 = vector.broadcast %cst_20 : f32 to vector<16x128xf32>
    %26 = arith.mulf %25, %22 : vector<16x128xf32>
    %27 = arith.select %24, %22, %26 : vector<16x128xi1>, vector<16x128xf32>
    %c0_21 = arith.constant 0 : index
    %c128_22 = arith.constant 128 : index
    %28 = vector.load %arg3[%c0_21, %c128_22] : memref<128x512xf32, #tpu.memory_space<vmem>>, vector<128x128xf32>
    %cst_23 = arith.constant dense<0.000000e+00> : vector<16x128xf32>
    %29 = tpu.matmul %27, %28, %cst_23 {dimension_numbers = #tpu.dot_dimension_numbers<[1], [0], [0], [1], [0, 0, 1, 1], [], []>} : vector<16x128xf32>, vector<128x128xf32>, vector<16x128xf32> -> vector<16x128xf32>
    %30 = vector.broadcast %2 : vector<1x128xf32> to vector<16x128xf32>
    %31 = arith.addf %29, %30 : vector<16x128xf32>
    %cst_24 = arith.constant 0.000000e+00 : f32
    %32 = vector.broadcast %cst_24 : f32 to vector<16x128xf32>
    %33 = arith.cmpf ogt, %31, %32 : vector<16x128xf32>
    %cst_25 = arith.constant 2.000000e-01 : f32
    %34 = vector.broadcast %cst_25 : f32 to vector<16x128xf32>
    %35 = arith.mulf %34, %31 : vector<16x128xf32>
    %36 = arith.select %33, %31, %35 : vector<16x128xi1>, vector<16x128xf32>
    %c0_26 = arith.constant 0 : index
    %c0_27 = arith.constant 0 : index
    %37 = vector.load %arg4[%c0_26, %c0_27] : memref<128x256xf32, #tpu.memory_space<vmem>>, vector<128x256xf32>
    %cst_28 = arith.constant dense<0.000000e+00> : vector<16x256xf32>
    %38 = tpu.matmul %36, %37, %cst_28 {dimension_numbers = #tpu.dot_dimension_numbers<[1], [0], [0], [1], [0, 0, 1, 1], [], []>} : vector<16x128xf32>, vector<128x256xf32>, vector<16x256xf32> -> vector<16x256xf32>
    %39 = vector.broadcast %3 : vector<1x256xf32> to vector<16x256xf32>
    %40 = arith.addf %38, %39 : vector<16x256xf32>
    %41 = vector.extract_strided_slice %40 {offsets = [0, 0], sizes = [16, 128], strides = [1, 1]} : vector<16x256xf32> to vector<16x128xf32>
    %42 = vector.extract_strided_slice %40 {offsets = [0, 128], sizes = [16, 128], strides = [1, 1]} : vector<16x256xf32> to vector<16x128xf32>
    %cst_29 = arith.constant 5.000000e-01 : f32
    %43 = vector.broadcast %cst_29 : f32 to vector<16x128xf32>
    %44 = arith.mulf %43, %42 : vector<16x128xf32>
    %45 = math.exp %44 : vector<16x128xf32>
    %46 = arith.mulf %45, %9 : vector<16x128xf32>
    %47 = arith.addf %41, %46 : vector<16x128xf32>
    %c0_30 = arith.constant 0 : index
    %c0_31 = arith.constant 0 : index
    %48 = vector.load %arg5[%c0_30, %c0_31] : memref<128x128xf32, #tpu.memory_space<vmem>>, vector<128x128xf32>
    %cst_32 = arith.constant dense<0.000000e+00> : vector<16x128xf32>
    %49 = tpu.matmul %47, %48, %cst_32 {dimension_numbers = #tpu.dot_dimension_numbers<[1], [0], [0], [1], [0, 0, 1, 1], [], []>} : vector<16x128xf32>, vector<128x128xf32>, vector<16x128xf32> -> vector<16x128xf32>
    %50 = vector.broadcast %4 : vector<1x128xf32> to vector<16x128xf32>
    %51 = arith.addf %49, %50 : vector<16x128xf32>
    %cst_33 = arith.constant 0.000000e+00 : f32
    %52 = vector.broadcast %cst_33 : f32 to vector<16x128xf32>
    %53 = arith.cmpf ogt, %51, %52 : vector<16x128xf32>
    %cst_34 = arith.constant 2.000000e-01 : f32
    %54 = vector.broadcast %cst_34 : f32 to vector<16x128xf32>
    %55 = arith.mulf %54, %51 : vector<16x128xf32>
    %56 = arith.select %53, %51, %55 : vector<16x128xi1>, vector<16x128xf32>
    %c0_35 = arith.constant 0 : index
    %c256_36 = arith.constant 256 : index
    %57 = vector.load %arg3[%c0_35, %c256_36] : memref<128x512xf32, #tpu.memory_space<vmem>>, vector<128x128xf32>
    %cst_37 = arith.constant dense<0.000000e+00> : vector<16x128xf32>
    %58 = tpu.matmul %56, %57, %cst_37 {dimension_numbers = #tpu.dot_dimension_numbers<[1], [0], [0], [1], [0, 0, 1, 1], [], []>} : vector<16x128xf32>, vector<128x128xf32>, vector<16x128xf32> -> vector<16x128xf32>
    %59 = vector.broadcast %5 : vector<1x128xf32> to vector<16x128xf32>
    %60 = arith.addf %58, %59 : vector<16x128xf32>
    %cst_38 = arith.constant 0.000000e+00 : f32
    %61 = vector.broadcast %cst_38 : f32 to vector<16x128xf32>
    %62 = arith.cmpf ogt, %60, %61 : vector<16x128xf32>
    %cst_39 = arith.constant 2.000000e-01 : f32
    %63 = vector.broadcast %cst_39 : f32 to vector<16x128xf32>
    %64 = arith.mulf %63, %60 : vector<16x128xf32>
    %65 = arith.select %62, %60, %64 : vector<16x128xi1>, vector<16x128xf32>
    %c0_40 = arith.constant 0 : index
    %c384_41 = arith.constant 384 : index
    %66 = vector.load %arg3[%c0_40, %c384_41] : memref<128x512xf32, #tpu.memory_space<vmem>>, vector<128x128xf32>
    %cst_42 = arith.constant dense<0.000000e+00> : vector<16x128xf32>
    %67 = tpu.matmul %65, %66, %cst_42 {dimension_numbers = #tpu.dot_dimension_numbers<[1], [0], [0], [1], [0, 0, 1, 1], [], []>} : vector<16x128xf32>, vector<128x128xf32>, vector<16x128xf32> -> vector<16x128xf32>
    %68 = vector.broadcast %6 : vector<1x128xf32> to vector<16x128xf32>
    %69 = arith.addf %67, %68 : vector<16x128xf32>
    %cst_43 = arith.constant 0.000000e+00 : f32
    %70 = vector.broadcast %cst_43 : f32 to vector<16x128xf32>
    %71 = arith.cmpf ogt, %69, %70 : vector<16x128xf32>
    %cst_44 = arith.constant 2.000000e-01 : f32
    %72 = vector.broadcast %cst_44 : f32 to vector<16x128xf32>
    %73 = arith.mulf %72, %69 : vector<16x128xf32>
    %74 = arith.select %71, %69, %73 : vector<16x128xi1>, vector<16x128xf32>
    %c0_45 = arith.constant 0 : index
    %c0_46 = arith.constant 0 : index
    %75 = vector.load %arg6[%c0_45, %c0_46] : memref<128x128xf32, #tpu.memory_space<vmem>>, vector<128x128xf32>
    %cst_47 = arith.constant dense<0.000000e+00> : vector<16x128xf32>
    %76 = tpu.matmul %74, %75, %cst_47 {dimension_numbers = #tpu.dot_dimension_numbers<[1], [0], [0], [1], [0, 0, 1, 1], [], []>} : vector<16x128xf32>, vector<128x128xf32>, vector<16x128xf32> -> vector<16x128xf32>
    %77 = vector.broadcast %7 : vector<1x128xf32> to vector<16x128xf32>
    %78 = arith.addf %76, %77 : vector<16x128xf32>
    %c0_48 = arith.constant 0 : index
    %c0_49 = arith.constant 0 : index
    %79 = vector.load %arg8[%c0_48, %c0_49] : memref<16x512xf32, #tpu.memory_space<vmem>>, vector<16x128xf32>
    tpu.vector_store %arg8[%c0_48, %c0_49], %78 {strides = array<i32>} : memref<16x512xf32, #tpu.memory_space<vmem>>, vector<16x128xf32>,
    %c0_50 = arith.constant 0 : index
    %c128_51 = arith.constant 128 : index
    %80 = vector.load %arg8[%c0_50, %c128_51] : memref<16x512xf32, #tpu.memory_space<vmem>>, vector<16x128xf32>
    tpu.vector_store %arg8[%c0_50, %c128_51], %47 {strides = array<i32>} : memref<16x512xf32, #tpu.memory_space<vmem>>, vector<16x128xf32>,
    %c0_52 = arith.constant 0 : index
    %c256_53 = arith.constant 256 : index
    %81 = vector.load %arg8[%c0_52, %c256_53] : memref<16x512xf32, #tpu.memory_space<vmem>>, vector<16x128xf32>
    tpu.vector_store %arg8[%c0_52, %c256_53], %41 {strides = array<i32>} : memref<16x512xf32, #tpu.memory_space<vmem>>, vector<16x128xf32>,
    %c0_54 = arith.constant 0 : index
    %c384_55 = arith.constant 384 : index
    %82 = vector.load %arg8[%c0_54, %c384_55] : memref<16x512xf32, #tpu.memory_space<vmem>>, vector<16x128xf32>
    tpu.vector_store %arg8[%c0_54, %c384_55], %42 {strides = array<i32>} : memref<16x512xf32, #tpu.memory_space<vmem>>, vector<16x128xf32>,
    return
  }
  func.func @transform_0(%arg0: i32) -> (i32, i32) {
    %c0_i32 = arith.constant 0 : i32
    %c0_i32_0 = arith.constant 0 : i32
    return %arg0, %c0_i32 : i32, i32
  }
  func.func @transform_1(%arg0: i32) -> (i32, i32) {
    %c0_i32 = arith.constant 0 : i32
    %c0_i32_0 = arith.constant 0 : i32
    %c0_i32_1 = arith.constant 0 : i32
    return %c0_i32, %c0_i32_0 : i32, i32
  }
  func.func @transform_2(%arg0: i32) -> (i32, i32) {
    %c0_i32 = arith.constant 0 : i32
    %c0_i32_0 = arith.constant 0 : i32
    %c0_i32_1 = arith.constant 0 : i32
    return %c0_i32, %c0_i32_0 : i32, i32
  }
  func.func @transform_3(%arg0: i32) -> (i32, i32) {
    %c0_i32 = arith.constant 0 : i32
    %c0_i32_0 = arith.constant 0 : i32
    %c0_i32_1 = arith.constant 0 : i32
    return %c0_i32, %c0_i32_0 : i32, i32
  }
  func.func @transform_4(%arg0: i32) -> (i32, i32) {
    %c0_i32 = arith.constant 0 : i32
    %c0_i32_0 = arith.constant 0 : i32
    %c0_i32_1 = arith.constant 0 : i32
    return %c0_i32, %c0_i32_0 : i32, i32
  }
  func.func @transform_5(%arg0: i32) -> (i32, i32) {
    %c0_i32 = arith.constant 0 : i32
    %c0_i32_0 = arith.constant 0 : i32
    %c0_i32_1 = arith.constant 0 : i32
    return %c0_i32, %c0_i32_0 : i32, i32
  }
  func.func @transform_6(%arg0: i32) -> (i32, i32) {
    %c0_i32 = arith.constant 0 : i32
    %c0_i32_0 = arith.constant 0 : i32
    %c0_i32_1 = arith.constant 0 : i32
    return %c0_i32, %c0_i32_0 : i32, i32
  }
  func.func @transform_7(%arg0: i32) -> (i32, i32) {
    %c0_i32 = arith.constant 0 : i32
    %c0_i32_0 = arith.constant 0 : i32
    return %arg0, %c0_i32 : i32, i32
  }
}

module attributes {stable_mosaic.version = 11 : i64} {
  func.func @_conditional_prior_kernel(%arg0: i32, %arg1: memref<16x256xf32, #tpu.memory_space<vmem>>, %arg2: memref<128x128xf32, #tpu.memory_space<vmem>>, %arg3: memref<128x512xf32, #tpu.memory_space<vmem>>, %arg4: memref<128x256xf32, #tpu.memory_space<vmem>>, %arg5: memref<128x128xf32, #tpu.memory_space<vmem>>, %arg6: memref<128x128xf32, #tpu.memory_space<vmem>>, %arg7: memref<1x1152xf32, #tpu.memory_space<vmem>>, %arg8: memref<16x512xf32, #tpu.memory_space<vmem>>) attributes {dimension_semantics = [#tpu.dimension_semantics<parallel>], iteration_bounds = array<i64: 2>, scalar_prefetch = 0 : i64, scratch_operands = 0 : i64, tpu.core_type = #tpu.core_type<tc>, window_params = [{transform_indices = @transform_0, window_bounds = array<i64: 16, 256>}, {pipeline_mode = #tpu.pipeline_mode<synchronous>, transform_indices = @transform_1, window_bounds = array<i64: 128, 128>}, {pipeline_mode = #tpu.pipeline_mode<synchronous>, transform_indices = @transform_2, window_bounds = array<i64: 128, 512>}, {pipeline_mode = #tpu.pipeline_mode<synchronous>, transform_indices = @transform_3, window_bounds = array<i64: 128, 256>}, {pipeline_mode = #tpu.pipeline_mode<synchronous>, transform_indices = @transform_4, window_bounds = array<i64: 128, 128>}, {pipeline_mode = #tpu.pipeline_mode<synchronous>, transform_indices = @transform_5, window_bounds = array<i64: 128, 128>}, {pipeline_mode = #tpu.pipeline_mode<synchronous>, transform_indices = @transform_6, window_bounds = array<i64: 1, 1152>}, {transform_indices = @transform_7, window_bounds = array<i64: 16, 512>}]} {
    %c0 = arith.constant 0 : index
    %c0_0 = arith.constant 0 : index
    %0 = vector.load %arg7[%c0, %c0_0] : memref<1x1152xf32, #tpu.memory_space<vmem>>, vector<1x128xf32>
    %c0_1 = arith.constant 0 : index
    %c128 = arith.constant 128 : index
    %1 = vector.load %arg7[%c0_1, %c128] : memref<1x1152xf32, #tpu.memory_space<vmem>>, vector<1x128xf32>
    %c0_2 = arith.constant 0 : index
    %c256 = arith.constant 256 : index
    %2 = vector.load %arg7[%c0_2, %c256] : memref<1x1152xf32, #tpu.memory_space<vmem>>, vector<1x128xf32>
    %c0_3 = arith.constant 0 : index
    %c384 = arith.constant 384 : index
    %3 = vector.load %arg7[%c0_3, %c384] : memref<1x1152xf32, #tpu.memory_space<vmem>>, vector<1x256xf32>
    %c0_4 = arith.constant 0 : index
    %c640 = arith.constant 640 : index
    %4 = vector.load %arg7[%c0_4, %c640] : memref<1x1152xf32, #tpu.memory_space<vmem>>, vector<1x128xf32>
    %c0_5 = arith.constant 0 : index
    %c768 = arith.constant 768 : index
    %5 = vector.load %arg7[%c0_5, %c768] : memref<1x1152xf32, #tpu.memory_space<vmem>>, vector<1x128xf32>
    %c0_6 = arith.constant 0 : index
    %c896 = arith.constant 896 : index
    %6 = vector.load %arg7[%c0_6, %c896] : memref<1x1152xf32, #tpu.memory_space<vmem>>, vector<1x128xf32>
    %c0_7 = arith.constant 0 : index
    %c1024 = arith.constant 1024 : index
    %7 = vector.load %arg7[%c0_7, %c1024] : memref<1x1152xf32, #tpu.memory_space<vmem>>, vector<1x128xf32>
    %c0_8 = arith.constant 0 : index
    %c0_9 = arith.constant 0 : index
    %8 = vector.load %arg1[%c0_8, %c0_9] : memref<16x256xf32, #tpu.memory_space<vmem>>, vector<16x128xf32>
    %c0_10 = arith.constant 0 : index
    %c128_11 = arith.constant 128 : index
    %9 = vector.load %arg1[%c0_10, %c128_11] : memref<16x256xf32, #tpu.memory_space<vmem>>, vector<16x128xf32>
    %c0_12 = arith.constant 0 : index
    %c0_13 = arith.constant 0 : index
    %10 = vector.load %arg2[%c0_12, %c0_13] : memref<128x128xf32, #tpu.memory_space<vmem>>, vector<128x128xf32>
    %cst = arith.constant dense<0.000000e+00> : vector<16x128xf32>
    %11 = tpu.matmul %8, %10, %cst {dimension_numbers = #tpu.dot_dimension_numbers<[1], [0], [0], [1], [0, 0, 1, 1], [], []>} : vector<16x128xf32>, vector<128x128xf32>, vector<16x128xf32> -> vector<16x128xf32>
    %12 = vector.broadcast %0 : vector<1x128xf32> to vector<16x128xf32>
    %13 = arith.addf %11, %12 : vector<16x128xf32>
    %cst_14 = arith.constant 0.000000e+00 : f32
    %14 = vector.broadcast %cst_14 : f32 to vector<16x128xf32>
    %15 = arith.cmpf ogt, %13, %14 : vector<16x128xf32>
    %cst_15 = arith.constant 2.000000e-01 : f32
    %16 = vector.broadcast %cst_15 : f32 to vector<16x128xf32>
    %17 = arith.mulf %16, %13 : vector<16x128xf32>
    %18 = arith.select %15, %13, %17 : vector<16x128xi1>, vector<16x128xf32>
    %c0_16 = arith.constant 0 : index
    %c0_17 = arith.constant 0 : index
    %19 = vector.load %arg3[%c0_16, %c0_17] : memref<128x512xf32, #tpu.memory_space<vmem>>, vector<128x128xf32>
    %cst_18 = arith.constant dense<0.000000e+00> : vector<16x128xf32>
    %20 = tpu.matmul %18, %19, %cst_18 {dimension_numbers = #tpu.dot_dimension_numbers<[1], [0], [0], [1], [0, 0, 1, 1], [], []>} : vector<16x128xf32>, vector<128x128xf32>, vector<16x128xf32> -> vector<16x128xf32>
    %21 = vector.broadcast %1 : vector<1x128xf32> to vector<16x128xf32>
    %22 = arith.addf %20, %21 : vector<16x128xf32>
    %cst_19 = arith.constant 0.000000e+00 : f32
    %23 = vector.broadcast %cst_19 : f32 to vector<16x128xf32>
    %24 = arith.cmpf ogt, %22, %23 : vector<16x128xf32>
    %cst_20 = arith.constant 2.000000e-01 : f32
    %25 = vector.broadcast %cst_20 : f32 to vector<16x128xf32>
    %26 = arith.mulf %25, %22 : vector<16x128xf32>
    %27 = arith.select %24, %22, %26 : vector<16x128xi1>, vector<16x128xf32>
    %c0_21 = arith.constant 0 : index
    %c128_22 = arith.constant 128 : index
    %28 = vector.load %arg3[%c0_21, %c128_22] : memref<128x512xf32, #tpu.memory_space<vmem>>, vector<128x128xf32>
    %cst_23 = arith.constant dense<0.000000e+00> : vector<16x128xf32>
    %29 = tpu.matmul %27, %28, %cst_23 {dimension_numbers = #tpu.dot_dimension_numbers<[1], [0], [0], [1], [0, 0, 1, 1], [], []>} : vector<16x128xf32>, vector<128x128xf32>, vector<16x128xf32> -> vector<16x128xf32>
    %30 = vector.broadcast %2 : vector<1x128xf32> to vector<16x128xf32>
    %31 = arith.addf %29, %30 : vector<16x128xf32>
    %cst_24 = arith.constant 0.000000e+00 : f32
    %32 = vector.broadcast %cst_24 : f32 to vector<16x128xf32>
    %33 = arith.cmpf ogt, %31, %32 : vector<16x128xf32>
    %cst_25 = arith.constant 2.000000e-01 : f32
    %34 = vector.broadcast %cst_25 : f32 to vector<16x128xf32>
    %35 = arith.mulf %34, %31 : vector<16x128xf32>
    %36 = arith.select %33, %31, %35 : vector<16x128xi1>, vector<16x128xf32>
    %c0_26 = arith.constant 0 : index
    %c0_27 = arith.constant 0 : index
    %37 = vector.load %arg4[%c0_26, %c0_27] : memref<128x256xf32, #tpu.memory_space<vmem>>, vector<128x256xf32>
    %cst_28 = arith.constant dense<0.000000e+00> : vector<16x256xf32>
    %38 = tpu.matmul %36, %37, %cst_28 {dimension_numbers = #tpu.dot_dimension_numbers<[1], [0], [0], [1], [0, 0, 1, 1], [], []>} : vector<16x128xf32>, vector<128x256xf32>, vector<16x256xf32> -> vector<16x256xf32>
    %39 = vector.broadcast %3 : vector<1x256xf32> to vector<16x256xf32>
    %40 = arith.addf %38, %39 : vector<16x256xf32>
    %41 = vector.extract_strided_slice %40 {offsets = [0, 0], sizes = [16, 128], strides = [1, 1]} : vector<16x256xf32> to vector<16x128xf32>
    %42 = vector.extract_strided_slice %40 {offsets = [0, 128], sizes = [16, 128], strides = [1, 1]} : vector<16x256xf32> to vector<16x128xf32>
    %cst_29 = arith.constant 5.000000e-01 : f32
    %43 = vector.broadcast %cst_29 : f32 to vector<16x128xf32>
    %44 = arith.mulf %43, %42 : vector<16x128xf32>
    %45 = math.exp %44 : vector<16x128xf32>
    %46 = arith.mulf %45, %9 : vector<16x128xf32>
    %47 = arith.addf %41, %46 : vector<16x128xf32>
    %c0_30 = arith.constant 0 : index
    %c0_31 = arith.constant 0 : index
    %48 = vector.load %arg5[%c0_30, %c0_31] : memref<128x128xf32, #tpu.memory_space<vmem>>, vector<128x128xf32>
    %cst_32 = arith.constant dense<0.000000e+00> : vector<16x128xf32>
    %49 = tpu.matmul %47, %48, %cst_32 {dimension_numbers = #tpu.dot_dimension_numbers<[1], [0], [0], [1], [0, 0, 1, 1], [], []>} : vector<16x128xf32>, vector<128x128xf32>, vector<16x128xf32> -> vector<16x128xf32>
    %50 = vector.broadcast %4 : vector<1x128xf32> to vector<16x128xf32>
    %51 = arith.addf %49, %50 : vector<16x128xf32>
    %cst_33 = arith.constant 0.000000e+00 : f32
    %52 = vector.broadcast %cst_33 : f32 to vector<16x128xf32>
    %53 = arith.cmpf ogt, %51, %52 : vector<16x128xf32>
    %cst_34 = arith.constant 2.000000e-01 : f32
    %54 = vector.broadcast %cst_34 : f32 to vector<16x128xf32>
    %55 = arith.mulf %54, %51 : vector<16x128xf32>
    %56 = arith.select %53, %51, %55 : vector<16x128xi1>, vector<16x128xf32>
    %c0_35 = arith.constant 0 : index
    %c256_36 = arith.constant 256 : index
    %57 = vector.load %arg3[%c0_35, %c256_36] : memref<128x512xf32, #tpu.memory_space<vmem>>, vector<128x128xf32>
    %cst_37 = arith.constant dense<0.000000e+00> : vector<16x128xf32>
    %58 = tpu.matmul %56, %57, %cst_37 {dimension_numbers = #tpu.dot_dimension_numbers<[1], [0], [0], [1], [0, 0, 1, 1], [], []>} : vector<16x128xf32>, vector<128x128xf32>, vector<16x128xf32> -> vector<16x128xf32>
    %59 = vector.broadcast %5 : vector<1x128xf32> to vector<16x128xf32>
    %60 = arith.addf %58, %59 : vector<16x128xf32>
    %cst_38 = arith.constant 0.000000e+00 : f32
    %61 = vector.broadcast %cst_38 : f32 to vector<16x128xf32>
    %62 = arith.cmpf ogt, %60, %61 : vector<16x128xf32>
    %cst_39 = arith.constant 2.000000e-01 : f32
    %63 = vector.broadcast %cst_39 : f32 to vector<16x128xf32>
    %64 = arith.mulf %63, %60 : vector<16x128xf32>
    %65 = arith.select %62, %60, %64 : vector<16x128xi1>, vector<16x128xf32>
    %c0_40 = arith.constant 0 : index
    %c384_41 = arith.constant 384 : index
    %66 = vector.load %arg3[%c0_40, %c384_41] : memref<128x512xf32, #tpu.memory_space<vmem>>, vector<128x128xf32>
    %cst_42 = arith.constant dense<0.000000e+00> : vector<16x128xf32>
    %67 = tpu.matmul %65, %66, %cst_42 {dimension_numbers = #tpu.dot_dimension_numbers<[1], [0], [0], [1], [0, 0, 1, 1], [], []>} : vector<16x128xf32>, vector<128x128xf32>, vector<16x128xf32> -> vector<16x128xf32>
    %68 = vector.broadcast %6 : vector<1x128xf32> to vector<16x128xf32>
    %69 = arith.addf %67, %68 : vector<16x128xf32>
    %cst_43 = arith.constant 0.000000e+00 : f32
    %70 = vector.broadcast %cst_43 : f32 to vector<16x128xf32>
    %71 = arith.cmpf ogt, %69, %70 : vector<16x128xf32>
    %cst_44 = arith.constant 2.000000e-01 : f32
    %72 = vector.broadcast %cst_44 : f32 to vector<16x128xf32>
    %73 = arith.mulf %72, %69 : vector<16x128xf32>
    %74 = arith.select %71, %69, %73 : vector<16x128xi1>, vector<16x128xf32>
    %c0_45 = arith.constant 0 : index
    %c0_46 = arith.constant 0 : index
    %75 = vector.load %arg6[%c0_45, %c0_46] : memref<128x128xf32, #tpu.memory_space<vmem>>, vector<128x128xf32>
    %cst_47 = arith.constant dense<0.000000e+00> : vector<16x128xf32>
    %76 = tpu.matmul %74, %75, %cst_47 {dimension_numbers = #tpu.dot_dimension_numbers<[1], [0], [0], [1], [0, 0, 1, 1], [], []>} : vector<16x128xf32>, vector<128x128xf32>, vector<16x128xf32> -> vector<16x128xf32>
    %77 = vector.broadcast %7 : vector<1x128xf32> to vector<16x128xf32>
    %78 = arith.addf %76, %77 : vector<16x128xf32>
    %c0_48 = arith.constant 0 : index
    %c0_49 = arith.constant 0 : index
    %79 = vector.load %arg8[%c0_48, %c0_49] : memref<16x512xf32, #tpu.memory_space<vmem>>, vector<16x128xf32>
    tpu.vector_store %arg8[%c0_48, %c0_49], %78 {strides = array<i32>} : memref<16x512xf32, #tpu.memory_space<vmem>>, vector<16x128xf32>,
    %c0_50 = arith.constant 0 : index
    %c128_51 = arith.constant 128 : index
    %80 = vector.load %arg8[%c0_50, %c128_51] : memref<16x512xf32, #tpu.memory_space<vmem>>, vector<16x128xf32>
    tpu.vector_store %arg8[%c0_50, %c128_51], %47 {strides = array<i32>} : memref<16x512xf32, #tpu.memory_space<vmem>>, vector<16x128xf32>,
    %c0_52 = arith.constant 0 : index
    %c256_53 = arith.constant 256 : index
    %81 = vector.load %arg8[%c0_52, %c256_53] : memref<16x512xf32, #tpu.memory_space<vmem>>, vector<16x128xf32>
    tpu.vector_store %arg8[%c0_52, %c256_53], %41 {strides = array<i32>} : memref<16x512xf32, #tpu.memory_space<vmem>>, vector<16x128xf32>,
    %c0_54 = arith.constant 0 : index
    %c384_55 = arith.constant 384 : index
    %82 = vector.load %arg8[%c0_54, %c384_55] : memref<16x512xf32, #tpu.memory_space<vmem>>, vector<16x128xf32>
    tpu.vector_store %arg8[%c0_54, %c384_55], %42 {strides = array<i32>} : memref<16x512xf32, #tpu.memory_space<vmem>>, vector<16x128xf32>,
    return
  }
  func.func @transform_0(%arg0: i32) -> (i32, i32) {
    %c0_i32 = arith.constant 0 : i32
    %c0_i32_0 = arith.constant 0 : i32
    return %arg0, %c0_i32 : i32, i32
  }
  func.func @transform_1(%arg0: i32) -> (i32, i32) {
    %c0_i32 = arith.constant 0 : i32
    %c0_i32_0 = arith.constant 0 : i32
    %c0_i32_1 = arith.constant 0 : i32
    return %c0_i32, %c0_i32_0 : i32, i32
  }
  func.func @transform_2(%arg0: i32) -> (i32, i32) {
    %c0_i32 = arith.constant 0 : i32
    %c0_i32_0 = arith.constant 0 : i32
    %c0_i32_1 = arith.constant 0 : i32
    return %c0_i32, %c0_i32_0 : i32, i32
  }
  func.func @transform_3(%arg0: i32) -> (i32, i32) {
    %c0_i32 = arith.constant 0 : i32
    %c0_i32_0 = arith.constant 0 : i32
    %c0_i32_1 = arith.constant 0 : i32
    return %c0_i32, %c0_i32_0 : i32, i32
  }
  func.func @transform_4(%arg0: i32) -> (i32, i32) {
    %c0_i32 = arith.constant 0 : i32
    %c0_i32_0 = arith.constant 0 : i32
    %c0_i32_1 = arith.constant 0 : i32
    return %c0_i32, %c0_i32_0 : i32, i32
  }
  func.func @transform_5(%arg0: i32) -> (i32, i32) {
    %c0_i32 = arith.constant 0 : i32
    %c0_i32_0 = arith.constant 0 : i32
    %c0_i32_1 = arith.constant 0 : i32
    return %c0_i32, %c0_i32_0 : i32, i32
  }
  func.func @transform_6(%arg0: i32) -> (i32, i32) {
    %c0_i32 = arith.constant 0 : i32
    %c0_i32_0 = arith.constant 0 : i32
    %c0_i32_1 = arith.constant 0 : i32
    return %c0_i32, %c0_i32_0 : i32, i32
  }
  func.func @transform_7(%arg0: i32) -> (i32, i32) {
    %c0_i32 = arith.constant 0 : i32
    %c0_i32_0 = arith.constant 0 : i32
    return %arg0, %c0_i32 : i32, i32
  }
}

</mosaic_0001>

<bundles_post_ra>
// kernel: tpu_custom_call.1
= control target key start
LH: loop header
LB: loop body
LE: loop exit
PB: predicated region body
PF: predicated region fallthrough
CT: control target
= control target key end

     0   :  { %s2850_s0 = inlined_call_operand.hbm [shape: f32[24,256], index: 0, kind: input, shape index: {}]   ;;  %s2851_s1 = inlined_call_operand.hbm [shape: f32[128,128], index: 1, kind: input, shape index: {}]   ;;  %s2852_s2 = inlined_call_operand.hbm [shape: f32[128,512], index: 2, kind: input, shape index: {}]   ;;  %s2853_s3 = inlined_call_operand.hbm [shape: f32[128,256], index: 3, kind: input, shape index: {}]   ;;  %s2854_s4 = inlined_call_operand.hbm [shape: f32[128,128], index: 4, kind: input, shape index: {}]   ;;  %s2855_s5 = inlined_call_operand.hbm [shape: f32[128,128], index: 5, kind: input, shape index: {}]   ;;  %s2856_s6 = inlined_call_operand.vmem [shape: f32[1,1152], index: 6, kind: input, shape index: {}]   ;;  %s2857_s7 = inlined_call_operand.hbm [shape: f32[24,512], index: 7, kind: output, shape index: {}]  }
   0x1   :  { %2869 = sst [smem:[#allocation23_spill]] %s2851_s1 }
   0x2   :  { %12 = vsyncpa [#allocation3], 0 }
   0x3   :  { %14 = vsyncpa [#allocation3 + $0x1], 0 }
   0x4   :  { %15 = vsyncpa [#allocation6], 0 }
   0x5   :  { %16 = vsyncpa [#allocation9], 0 }
   0x6   :  { %17 = vsyncpa [#allocation12], 0 }
   0x7   :  { %18 = vsyncpa [#allocation4], 0 }
   0x8   :  { %20 = vsyncpa [#allocation4 + $0x1], 0  ;;  %s2485_s24 = smov 0   ;;  %s2487_s25 = smov 0  }
   0x9   :  { %s2489_s26 = smov 0   ;;  %s2491_s27 = smov 0  }
   0xa LB: > { %2870 = sst [smem:[#allocation19_spill]] %s2413_s24  ;;  %s2506_s28 = sadd.s32 4294967295, %s2425_s27   ;;  %s2425_s27 = sphi %s2491_s27, %s2897_s27   ;;  %s2421_s26 = sphi %s2489_s26, %s2901_s26   ;;  %s2417_s25 = sphi %s2487_s25, %s2900_s25   ;;  %s2413_s24 = sphi %s2485_s24, %s2899_s24  }
   0xb   : > { %s1398_s29 = sadd.s32 4294967294, %s2425_s27   ;;  %s2510_s30 = sadd.s32 1, %s2425_s27  }
   0xc   : > { %2871 = sst [smem:[#allocation20_spill]] %s2510_s30  ;;  %s33_s8 = sadd.s32 1, %s2421_s26 }
   0xd   : > { %s30_s9 = ssub.s32 %s2425_s27, %s2510_s30  ;;  %p40_p0 = scmp.ne.s32.totalorder %s2421_s26, %s2417_s25 }
   0xe   : > { %p31_p1 = scmp.eq.s32.totalorder %s30_s9, 0  ;;  %p41_p2 = scmp.eq.s32.totalorder %s2425_s27, 0 }
   0xf   : > { %p46_p3 = scmp.ne.s32.totalorder %s2417_s25, %s2413_s24  ;;  %p2858_p4 = scmp.eq.s32.totalorder %s2506_s28, 0 }
  0x10   : > { %s2522_s10 = scalar_select %p31_p1, %s2421_s26, %s33_s8  }
  0x11   : > { %p2524_p5 = por %p41_p2, %p40_p0  ;;  %p2530_p6 = por %p2858_p4, %p46_p3 }
  0x12   : > { %2872 = sst [smem:[#allocation21_spill]] %s2522_s10  ;;  %p196_p7 = scmp.eq.s32.totalorder %s2506_s28, 1 }
  0x13   : > { %s2873_s11 = scalar_select %p2524_p5, 1, 0 }
  0x14   : > { %s2874_s12 = scalar_select %p2530_p6, 1, 0 }
  0x15   : > { %p202_p8 = scmp.eq.s32.totalorder %s1398_s29, 1  ;;  %p1399_p9 = scmp.ge.s32.totalorder %s2425_s27, 1 }
  0x16   : > { %p209_p10 = scmp.lt.s32.totalorder %s2425_s27, 3  ;;  %p2537_p11 = por %p196_p7, %p40_p0 }
  0x17   : > { %p2541_p12 = por %p202_p8, %p46_p3  ;;  %s2427_s16 = smov [#allocation5]  }
  0x18   : > { %s2875_s13 = scalar_select %p2537_p11, 1, 0 }
  0x19   : > { %s2876_s14 = scalar_select %p2541_p12, 1, 0 }
  0x1a   : > { %p2545_p13 = pnand %p1399_p9, %p209_p10  ;;  %s221_s17 = sshll.u32 %s2427_s16, 4  ;;  %s222_s17 = int_to_ptr.vmem [resolvable:$true] %s221_s17 }
  0x1b   : > { %2877 = sst [smem:[#allocation22_spill]] %s2876_s14  ;;  %s2428_s19 = smov [#allocation8]  }
  0x1c   : > { %s2878_s15 = scalar_select %p2545_p13, 1, 0 }
  0x1d   : > { %p2096_p1 = pneg %p2545_p13  ;;  %s247_s20 = sshll.u32 %s2428_s19, 4  ;;  %s2557_s20 = int_to_ptr.vmem [resolvable:$true] %s247_s20 }
  0x1e   : > { %s2880_s1 = sld [smem:[#allocation23_spill]] }
  0x1f   : > { %p2553_p2 = pnand %p2096_p1, %p2858_p4 }
  0x21   : > { %p2567_p3 = pneg %p2553_p2 }
  0x24   : > { %s2179_s23 = scalar_lea.hbm %s2880_s1, 2048 }
  0x25   : > { %p2180_p0 = scmp.ne.s32.totalorder %s2880_s1, %s2179_s23  ;;  %p2186_p9 = scmp.lt.u32.totalorder %s2179_s23, %s2880_s1 }
  0x27   : > { %p2182_p7 = pnand %p2567_p3, %p2180_p0 }
  0x29   : > { %p2183_p8 = pneg %p2182_p7 }
  0x2b   : > { %p2188_p10 = pnand %p2186_p9, %p2183_p8 }
  0x2d   : > { %2191 = shalt.err (!%p2188_p10)
}
  0x2e   : > { %s2192_s21 = scalar_lea.vmem %s222_s17, 2048  ;;  %p2200_p11 = scmp.lt.s32.totalorder %s222_s17, %s222_s17 }
  0x2f   : > { %p2193_p1 = scmp.ne.s32.totalorder %s222_s17, %s2192_s21  ;;  %p2201_p6 = scmp.lt.s32.totalorder %s2192_s21, %s2192_s21 }
  0x31   : > { %p2195_p4 = pnand %p2193_p1, %p2567_p3  ;;  %p2202_p13 = por %p2201_p6, %p2200_p11 }
  0x33   : > { %p2196_p12 = pneg %p2195_p4 }
  0x35   : > { %p2203_p5 = pnand %p2202_p13, %p2196_p12 }
  0x37   : > { %2206 = shalt.err (!%p2203_p5)
}
  0x38   : > { %s2865_s22 = smov 128   ;;  %s2867_s29 = smov 8  }
  0x39   : > { %2099 = dma.hbm_to_vmem [thread:$0]  (!%p2553_p2), %s2880_s1, 2048, %s222_s17, [#allocation6], %s2865_s22, %s2865_s22, %s2867_s29  }
  0x3a   : > { %s2207_s10 = scalar_lea.hbm %s2853_s3, 4096 }
  0x3b   : > { %p2208_p4 = scmp.ne.s32.totalorder %s2853_s3, %s2207_s10  ;;  %p2214_p11 = scmp.lt.u32.totalorder %s2207_s10, %s2853_s3 }
  0x3d   : > { %p2210_p5 = pnand %p2208_p4, %p2567_p3 }
  0x3f   : > { %p2211_p6 = pneg %p2210_p5 }
  0x41   : > { %p2216_p12 = pnand %p2214_p11, %p2211_p6 }
  0x43   : > { %2219 = shalt.err (!%p2216_p12)
}
  0x44   : > { %s2220_s17 = scalar_lea.vmem %s2557_s20, 4096  ;;  %p2228_p8 = scmp.lt.s32.totalorder %s2557_s20, %s2557_s20 }
  0x45   : > { %p2221_p13 = scmp.ne.s32.totalorder %s2557_s20, %s2220_s17  ;;  %p2229_p9 = scmp.lt.s32.totalorder %s2220_s17, %s2220_s17 }
  0x47   : > { %p2223_p0 = pnand %p2221_p13, %p2567_p3  ;;  %p2230_p10 = por %p2229_p9, %p2228_p8 }
  0x49   : > { %p2224_p7 = pneg %p2223_p0 }
  0x4b   : > { %p2231_p1 = pnand %p2230_p10, %p2224_p7 }
  0x4d   : > { %2234 = shalt.err (!%p2231_p1)
}
  0x4e   : > { %s2431_s30 = smov 256   ;;  %s2432_s24 = smov 16  }
  0x4f   : > { %2105 = dma.hbm_to_vmem [thread:$0]  (!%p2553_p2), %s2853_s3, 4096, %s2557_s20, [#allocation9], %s2431_s30, %s2431_s30, %s2432_s24  }
  0x50   : > { %s2433_s23 = smov [#allocation7]   ;;  %s2235_s21 = scalar_lea.hbm %s2852_s2, 8192 }
  0x51   : > { %s234_s8 = sshll.u32 %s2433_s23, 4  ;;  %p2236_p4 = scmp.ne.s32.totalorder %s2852_s2, %s2235_s21  ;;  %s235_s8 = int_to_ptr.vmem [resolvable:$true] %s234_s8 }
  0x52   : > { %p2242_p11 = scmp.lt.u32.totalorder %s2235_s21, %s2852_s2 }
  0x53   : > { %p2238_p5 = pnand %p2236_p4, %p2567_p3 }
  0x55   : > { %p2239_p6 = pneg %p2238_p5 }
  0x57   : > { %p2244_p12 = pnand %p2242_p11, %p2239_p6 }
  0x59   : > { %2247 = shalt.err (!%p2244_p12)
}
  0x5a   : > { %s2248_s20 = scalar_lea.vmem %s235_s8, 8192  ;;  %p2256_p8 = scmp.lt.s32.totalorder %s235_s8, %s235_s8 }
  0x5b   : > { %p2249_p13 = scmp.ne.s32.totalorder %s235_s8, %s2248_s20  ;;  %p2257_p9 = scmp.lt.s32.totalorder %s2248_s20, %s2248_s20 }
  0x5d   : > { %p2251_p0 = pnand %p2249_p13, %p2567_p3  ;;  %p2258_p10 = por %p2257_p9, %p2256_p8 }
  0x5f   : > { %p2252_p7 = pneg %p2251_p0 }
  0x61   : > { %p2259_p1 = pnand %p2258_p10, %p2252_p7 }
  0x63   : > { %2262 = shalt.err (!%p2259_p1)
}
  0x64   : > { %s2434_s22 = smov 512   ;;  %s2435_s30 = smov 32  }
  0x65   : > { %2102 = dma.hbm_to_vmem [thread:$0]  (!%p2553_p2), %s2852_s2, 8192, %s235_s8, [#allocation6], %s2434_s22, %s2434_s22, %s2435_s30  }
  0x66   : > { %s2436_s24 = smov [#allocation10]   ;;  %s2437_s14 = smov [#allocation11]  }
  0x67   : > { %s260_s10 = sshll.u32 %s2436_s24, 4  ;;  %s273_s23 = sshll.u32 %s2437_s14, 4  ;;  %s261_s10 = int_to_ptr.vmem [resolvable:$true] %s260_s10  ;;  %s2627_s23 = int_to_ptr.vmem [resolvable:$true] %s273_s23 }
  0x68   : > { %s2263_s21 = scalar_lea.hbm %s2854_s4, 2048 }
  0x69   : > { %p2264_p4 = scmp.ne.s32.totalorder %s2854_s4, %s2263_s21  ;;  %p2270_p11 = scmp.lt.u32.totalorder %s2263_s21, %s2854_s4 }
  0x6b   : > { %p2266_p5 = pnand %p2264_p4, %p2567_p3 }
  0x6d   : > { %p2267_p6 = pneg %p2266_p5 }
  0x6f   : > { %p2272_p12 = pnand %p2270_p11, %p2267_p6 }
  0x71   : > { %2275 = shalt.err (!%p2272_p12)
}
  0x72   : > { %s2276_s22 = scalar_lea.vmem %s261_s10, 2048  ;;  %p2284_p8 = scmp.lt.s32.totalorder %s261_s10, %s261_s10 }
  0x73   : > { %p2277_p13 = scmp.ne.s32.totalorder %s261_s10, %s2276_s22  ;;  %p2285_p9 = scmp.lt.s32.totalorder %s2276_s22, %s2276_s22 }
  0x75   : > { %p2279_p0 = pnand %p2277_p13, %p2567_p3  ;;  %p2286_p10 = por %p2285_p9, %p2284_p8 }
  0x77   : > { %p2280_p7 = pneg %p2279_p0 }
  0x79   : > { %p2287_p1 = pnand %p2286_p10, %p2280_p7 }
  0x7b   : > { %2290 = shalt.err (!%p2287_p1)
}
  0x7c   : > { %s2882_s30 = smov 8   ;;  %s2883_s29 = smov 128  }
  0x7d   : > { %2108 = dma.hbm_to_vmem [thread:$0]  (!%p2553_p2), %s2854_s4, 2048, %s261_s10, [#allocation9], %s2883_s29, %s2883_s29, %s2882_s30  }
  0x7e   : > { %s2291_s21 = scalar_lea.hbm %s2855_s5, 2048 }
  0x7f   : > { %p2292_p4 = scmp.ne.s32.totalorder %s2855_s5, %s2291_s21  ;;  %p2298_p11 = scmp.lt.u32.totalorder %s2291_s21, %s2855_s5 }
  0x81   : > { %p2294_p5 = pnand %p2292_p4, %p2567_p3 }
  0x83   : > { %p2295_p6 = pneg %p2294_p5 }
  0x85   : > { %p2300_p12 = pnand %p2298_p11, %p2295_p6 }
  0x87   : > { %2303 = shalt.err (!%p2300_p12)
}
  0x88   : > { %s2304_s10 = scalar_lea.vmem %s2627_s23, 2048  ;;  %p2312_p8 = scmp.lt.s32.totalorder %s2627_s23, %s2627_s23 }
  0x89   : > { %p2305_p13 = scmp.ne.s32.totalorder %s2627_s23, %s2304_s10  ;;  %p2313_p9 = scmp.lt.s32.totalorder %s2304_s10, %s2304_s10 }
  0x8b   : > { %p2307_p0 = pnand %p2305_p13, %p2567_p3  ;;  %p2314_p10 = por %p2313_p9, %p2312_p8 }
  0x8d   : > { %p2308_p7 = pneg %p2307_p0 }
  0x8f   : > { %p2315_p1 = pnand %p2314_p10, %p2308_p7 }
  0x91   : > { %2318 = shalt.err (!%p2315_p1)
}
  0x92   : > { %2111 = dma.hbm_to_vmem [thread:$0]  (!%p2553_p2), %s2855_s5, 2048, %s2627_s23, [#allocation12], %s2883_s29, %s2883_s29, %s2882_s30  }
  0x93   : > { %p1405_p3 = scmp.ge.s32.totalorder %s2425_s27, 2 }
  0x94   : > { %p2884_p4 = scmp.ne.s32.totalorder (!%p1405_p3), %s2873_s11, 0 }
  0x95   : > { %286 = sbr.rel (%p1405_p3) target bundleno = 191 (0xbf), region = 40 }
  0x9c   : > { %289 = sbr.rel (!%p2884_p4) target bundleno = 191 (0xbf), region = 44  ;;  %s290_s9 = sand.u32 (%p2884_p4), 1, %s2421_s26  }
  0x9d   : > { %s1407_s18 = sshll.u32 (%p2884_p4), %s2425_s27, 1  ;;  %s1406_s14 = sshll.u32 (%p2884_p4), %s290_s9, 5 }
  0x9e   : > { %s296_s16 = ssub.s32 (%p2884_p4), 3, %s1407_s18  ;;  %s2686_s30 = scalar_lea.sflag (%p2884_p4), [#allocation3], %s290_s9 }
  0x9f   : > { %p297_p5 = scmp.lt.s32.totalorder (%p2884_p4), %s296_s16, 2  ;;  %s294_s29 = scalar_lea.vmem (%p2884_p4), [#allocation2], %s1406_s14 }
  0xa3   : > { %s2903_s16 = smov (!%p297_p5, %s296_s16), 2 }
  0xa4   : > { %s2683_s19 = sshll.u32 %s2903_s16, 8 }
  0xa5   : > { %s302_s23 = ssub.s32 512, %s2683_s19 }
  0xa6   : > { %303 = vsyncadd %s2686_s30, %s302_s23  ;;  %p1410_p2 = scmp.ne.s32.totalorder %s2683_s19, 0  ;;  %s1443_s11 = sshll.u32 %s2425_s27, 9 }
  0xa7   : > { %s2694_s20 = scalar_lea.hbm %s2850_s0, %s1443_s11  ;;  %s309_s1 = sshll.u32 %s294_s29, 4  ;;  %s2696_s1 = int_to_ptr.vmem [resolvable:$true] %s309_s1 }
  0xa8   : > { %s2319_s8 = scalar_lea.hbm %s2694_s20, %s2683_s19  ;;  %s2323_s24 = scalar_lea.hbm %s2850_s0, 768 }
  0xa9   : > { %p2320_p6 = scmp.ne.s32.totalorder %s2694_s20, %s2319_s8  ;;  %p2324_p13 = scmp.lt.u32.totalorder %s2694_s20, %s2850_s0 }
  0xaa   : > { %p2325_p0 = scmp.lt.u32.totalorder %s2323_s24, %s2319_s8  ;;  %p2327_p8 = scmp.lt.u32.totalorder %s2319_s8, %s2694_s20 }
  0xab   : > { %p2321_p11 = pnand %p2320_p6, %p1410_p2 }
  0xac   : > { %p2326_p7 = por %p2325_p0, %p2324_p13 }
  0xad   : > { %p2322_p12 = pneg %p2321_p11 }
  0xae   : > { %p2328_p9 = por %p2327_p8, %p2326_p7 }
  0xb0   : > { %p2329_p10 = pnand %p2328_p9, %p2322_p12 }
  0xb2   : > { %2332 = shalt.err (!%p2329_p10)
}
  0xb3   : > { %s2333_s14 = scalar_lea.vmem %s2696_s1, %s2683_s19  ;;  %s2438_s16 = smov [#allocation2]  }
  0xb4   : > { %p2334_p1 = scmp.ne.s32.totalorder %s2696_s1, %s2333_s14  ;;  %s2337_s23 = sshll.u32 %s2438_s16, 4  ;;  %s2338_s23 = int_to_ptr.vmem [resolvable:$false] %s2337_s23 }
  0xb5   : > { %s2339_s29 = scalar_lea.vmem %s2338_s23, 1024  ;;  %p2340_p6 = scmp.lt.s32.totalorder %s2696_s1, %s2338_s23 }
  0xb6   : > { %p2335_p4 = pnand %p2334_p1, %p1410_p2  ;;  %p2341_p11 = scmp.lt.s32.totalorder %s2339_s29, %s2333_s14 }
  0xb8   : > { %p2336_p5 = pneg %p2335_p4  ;;  %p2342_p13 = por %p2341_p11, %p2340_p6 }
  0xba   : > { %p2343_p0 = pnand %p2342_p13, %p2336_p5 }
  0xbc   : > { %2346 = shalt.err (!%p2343_p0)
}
  0xbd   : > { %s2439_s11 = smov 256   ;;  %s2440_s21 = smov 16  }
  0xbe   : > { %315 = dma.hbm_to_vmem [thread:$0]  (%p1410_p2), %s2694_s20, %s2683_s19, %s2696_s1, %s2686_s30, %s2439_s11, %s2439_s11, %s2440_s21  }
  0xbf PF: > { %p2885_p12 = scmp.ne.s32.totalorder %s2878_s15, 0 }
  0xc0   : > { %s2726_s17 = sand.u32 (!%p2885_p12), 1, %s2417_s25   ;;  %p2886_p7 = scmp.ne.s32.totalorder (!%p2885_p12), %s2874_s12, 0 }
  0xc1   : > { %321 = sbr.rel (%p2885_p12) target bundleno = 2040 (0x7f8), region = 48  ;;  %s1416_s8 = sshll.u32 (!%p2885_p12), %s2726_s17, 5 }
  0xc2   : > { %s324_s10 = scalar_lea.sflag (!%p2885_p12), [#allocation3], %s2726_s17  ;;  %s2730_s22 = scalar_lea.vmem (!%p2885_p12), [#allocation2], %s1416_s8 }
  0xc8   : > { %2392 = dma.done.wait (%p2886_p7), %s324_s10, 512  }
  0xc9   : > { %2394 = vsyncadd (%p2886_p7), %s324_s10, 4294966784  ;;  %p2887_p2 = scmp.eq.s32.totalorder %s2506_s28, 0 }
  0xcb   : > { %2396 = dma.done.wait (%p2887_p2), [#allocation6], 10240   ;;  %p2888_p8 = pmov %p2887_p2 }
  0xcc   : > { %p2889_p9 = pmov %p2887_p2 }
  0xcd   : > { %2398 = vsyncadd (%p2888_p8), [#allocation6], 4294957056 }
  0xce   : > { %2400 = dma.done.wait (%p2889_p9), [#allocation9], 6144   ;;  %p2890_p10 = pmov %p2887_p2 }
  0xcf   : > { %p2891_p1 = pmov %p2887_p2 }
  0xd0   : > { %2402 = vsyncadd (%p2890_p10), [#allocation9], 4294961152 }
  0xd1   : > { %2404 = dma.done.wait (%p2891_p1), [#allocation12], 2048   ;;  %p2892_p4 = pmov %p2891_p1 }
  0xd2   : > { %v402_v0 = vld [vmem:[#allocation5] sm:$0xff]  ;;  %v403_v1 = vld [vmem:[#allocation5 + $0x8] sm:$0xff]  ;;  %v404_v2 = vld [vmem:[#allocation5 + $0x10] sm:$0xff]  ;;  %s1422_s18 = sshll.u32 %s2726_s17, 6  ;;  %s1256_s12 = scalar_lea.sflag [#allocation4], %s2726_s17 }
  0xd3   : > { %2406 = vsyncadd (%p2892_p4), [#allocation12], 4294965248  ;;  %v1818_v3 = vpack.c.bf16 %v403_v1, %v402_v0  ;;  %v405_v4 = vld [vmem:[#allocation5 + $0x18] sm:$0xff]  ;;  %v406_v6 = vld [vmem:[#allocation5 + $0x20] sm:$0xff]  ;;  %s2763_s14 = scalar_lea.vmem [#allocation13], %s1422_s18  ;;  %p2893_p5 = scmp.ne.s32.totalorder %s2875_s13, 0 }
  0xd4   : > { %v1822_v5 = vpack.c.bf16 %v405_v4, %v404_v2  ;;  %v407_v7 = vld [vmem:[#allocation5 + $0x28] sm:$0xff]  ;;  %v408_v9 = vld [vmem:[#allocation5 + $0x30] sm:$0xff]  ;;  %v409_v10 = vld [vmem:[#allocation5 + $0x38] sm:$0xff]  ;;  %s1431_s15 = sshll.u32 (%p2893_p5), %s2506_s28, 1 }
  0xd5   : > { %1819 = vmatprep.subr.bf16.mxu0 %v1818_v3  ;;  %v1826_v8 = vpack.c.bf16 %v407_v7, %v406_v6  ;;  %v398_v11 = vld [vmem:[%s2730_s22] sm:$0xff]  ;;  %v1830_v20 = vpack.c.bf16 %v409_v10, %v408_v9  ;;  %v411_v22 = vld [vmem:[#allocation5 + $0x48] sm:$0xff]  ;;  %v412_v27 = vld [vmem:[#allocation5 + $0x50] sm:$0xff]  ;;  %s1264_s19 = ssub.s32 (%p2893_p5), 3, %s1431_s15 }
  0xd6   : > { %1821 = vmatpush3.bf16.msra.mxu0 %v1818_v3  ;;  %1605 = vmatprep.mubr.f32.mxu0 %v398_v11  ;;  %v505_v12 = vld [vmem:[#allocation7] sm:$0xff]  ;;  %v413_v28 = vld [vmem:[#allocation5 + $0x58] sm:$0xff]  ;;  %v415_v34 = vld [vmem:[#allocation5 + $0x68] sm:$0xff]  ;;  %p1265_p6 = scmp.lt.s32.totalorder (%p2893_p5), %s1264_s19, 2 }
  0xd7   : > { %1823 = vmatprep.subr.bf16.mxu0 %v1822_v5  ;;  %v506_v13 = vld [vmem:[#allocation7 + $0x20] sm:$0xff]  ;;  %v1838_v32 = vpack.c.bf16 %v413_v28, %v412_v27  ;;  %v416_v39 = vld [vmem:[#allocation5 + $0x70] sm:$0xff]  ;;  %v417_v40 = vld [vmem:[#allocation5 + $0x78] sm:$0xff] }
  0xd8   : > { %v507_v14 = vld [vmem:[#allocation7 + $0x40] sm:$0xff]  ;;  %v1850_v15 = vpack.c.bf16 %v506_v13, %v505_v12  ;;  %v1846_v42 = vpack.c.bf16 %v417_v40, %v416_v39  ;;  %v399_v43 = vld [vmem:[%s2730_s22 + $0x10] sm:$0xff]  ;;  %v608_v50 = vld [vmem:[#allocation7 + $0x8] sm:$0xff] }
  0xd9   : > { %v508_v16 = vld [vmem:[#allocation7 + $0x60] sm:$0xff]  ;;  %v609_v51 = vld [vmem:[#allocation7 + $0x28] sm:$0xff] }
  0xda   : > { %1825 = vmatpush3.bf16.msra.mxu0 %v1822_v5  ;;  %v1854_v17 = vpack.c.bf16 %v508_v16, %v507_v14  ;;  %v509_v18 = vld [vmem:[#allocation7 + $0x80] sm:$0xff]  ;;  %1851 = vmatprep.subr.bf16.mxu1 %v1850_v15  ;;  %v610_v52 = vld [vmem:[#allocation7 + $0x48] sm:$0xff]  ;;  %v1882_v53 = vpack.c.bf16 %v609_v51, %v608_v50 }
  0xdb   : > { %v510_v19 = vld [vmem:[#allocation7 + $0xa0] sm:$0xff]  ;;  %1827 = vmatprep.subr.bf16.mxu0 %v1826_v8  ;;  %1853 = vmatpush3.bf16.msra.mxu1 %v1850_v15  ;;  %v611_v54 = vld [vmem:[#allocation7 + $0x68] sm:$0xff] }
  0xdc   : > { %v410_v21 = vld [vmem:[#allocation5 + $0x40] sm:$0xff]  ;;  %1855 = vmatprep.subr.bf16.mxu1 %v1854_v17  ;;  %v1858_v23 = vpack.c.bf16 %v510_v19, %v509_v18  ;;  %v1886_v55 = vpack.c.bf16 %v611_v54, %v610_v52  ;;  %v612_v56 = vld [vmem:[#allocation7 + $0x88] sm:$0xff] }
  0xdd   : > { %v511_v24 = vld [vmem:[#allocation7 + $0xc0] sm:$0xff]  ;;  %v1834_v26 = vpack.c.bf16 %v411_v22, %v410_v21  ;;  %v613_v57 = vld [vmem:[#allocation7 + $0xa8] sm:$0xff] }
  0xde   : > { %1829 = vmatpush3.bf16.msra.mxu0 %v1826_v8  ;;  %v512_v25 = vld [vmem:[#allocation7 + $0xe0] sm:$0xff]  ;;  %v1890_v58 = vpack.c.bf16 %v613_v57, %v612_v56  ;;  %v614_v59 = vld [vmem:[#allocation7 + $0xc8] sm:$0xff] }
  0xdf   : > { %1831 = vmatprep.subr.bf16.mxu0 %v1830_v20  ;;  %1857 = vmatpush3.bf16.msra.mxu1 %v1854_v17  ;;  %v1862_v29 = vpack.c.bf16 %v512_v25, %v511_v24  ;;  %v513_v30 = vld [vmem:[#allocation7 + $0x100] sm:$0xff]  ;;  %v615_v60 = vld [vmem:[#allocation7 + $0xe8] sm:$0xff]  ;;  %v718_v25 = vld [vmem:[#allocation8 + $0x38] sm:$0xff] }
  0xe0   : > { %1859 = vmatprep.subr.bf16.mxu1 %v1858_v23  ;;  %v514_v31 = vld [vmem:[#allocation7 + $0x120] sm:$0xff]  ;;  %v1894_v61 = vpack.c.bf16 %v615_v60, %v614_v59  ;;  %v616_v62 = vld [vmem:[#allocation7 + $0x108] sm:$0xff] }
  0xe1   : > { %v414_v33 = vld [vmem:[#allocation5 + $0x60] sm:$0xff]  ;;  %v1866_v35 = vpack.c.bf16 %v514_v31, %v513_v30  ;;  %v617_v63 = vld [vmem:[#allocation7 + $0x128] sm:$0xff]  ;;  %v722_v31 = vld [vmem:[#allocation8 + $0x58] sm:$0xff] }
  0xe2   : > { %1833 = vmatpush3.bf16.msra.mxu0 %v1830_v20  ;;  %v515_v36 = vld [vmem:[#allocation7 + $0x140] sm:$0xff]  ;;  %v1842_v38 = vpack.c.bf16 %v415_v34, %v414_v33  ;;  %v1898_v0 = vpack.c.bf16 %v617_v63, %v616_v62  ;;  %v618_v1 = vld [vmem:[#allocation7 + $0x148] sm:$0xff]  ;;  %v714_v20 = vld [vmem:[#allocation8 + $0x18] sm:$0xff] }
  0xe3   : > { %1835 = vmatprep.subr.bf16.mxu0 %v1834_v26  ;;  %1861 = vmatpush3.bf16.msra.mxu1 %v1858_v23  ;;  %v516_v37 = vld [vmem:[#allocation7 + $0x160] sm:$0xff]  ;;  %v619_v2 = vld [vmem:[#allocation7 + $0x168] sm:$0xff]  ;;  %v713_v23 = vld [vmem:[#allocation8 + $0x10] sm:$0xff] }
  0xe4   : > { %1863 = vmatprep.subr.bf16.mxu1 %v1862_v29  ;;  %v1870_v41 = vpack.c.bf16 %v516_v37, %v515_v36  ;;  %v517_v44 = vld [vmem:[#allocation7 + $0x180] sm:$0xff]  ;;  %v1902_v3 = vpack.c.bf16 %v619_v2, %v618_v1  ;;  %v620_v13 = vld [vmem:[#allocation7 + $0x188] sm:$0xff]  ;;  %v726_v37 = vld [vmem:[#allocation8 + $0x78] sm:$0xff] }
  0xe5   : > { %v518_v45 = vld [vmem:[#allocation7 + $0x1a0] sm:$0xff]  ;;  %v621_v14 = vld [vmem:[#allocation7 + $0x1a8] sm:$0xff] }
  0xe6   : > { %1837 = vmatpush3.bf16.msra.mxu0 %v1834_v26  ;;  %v1874_v46 = vpack.c.bf16 %v518_v45, %v517_v44  ;;  %v519_v47 = vld [vmem:[#allocation7 + $0x1c0] sm:$0xff]  ;;  %v1906_v15 = vpack.c.bf16 %v621_v14, %v620_v13  ;;  %v622_v16 = vld [vmem:[#allocation7 + $0x1c8] sm:$0xff] }
  0xe7   : > { %1839 = vmatprep.subr.bf16.mxu0 %v1838_v32  ;;  %1865 = vmatpush3.bf16.msra.mxu1 %v1862_v29  ;;  %v520_v48 = vld [vmem:[#allocation7 + $0x1e0] sm:$0xff]  ;;  %v623_v17 = vld [vmem:[#allocation7 + $0x1e8] sm:$0xff]  ;;  %v717_v29 = vld [vmem:[#allocation8 + $0x30] sm:$0xff] }
  0xe8   : > { %1867 = vmatprep.subr.bf16.mxu1 %v1866_v35  ;;  %v1878_v49 = vpack.c.bf16 %v520_v48, %v519_v47  ;;  %v1423_v4 = vld [vmem:[%s2856_s6] ss:$0 sm:$0xff]  ;;  %v1910_v18 = vpack.c.bf16 %v623_v17, %v622_v16  ;;  %v712_v19 = vld [vmem:[#allocation8 + $0x8] sm:$0xff]  ;;  %v729_v47 = vld [vmem:[#allocation8 + $0x90] sm:$0xff] }
  0xe9   : > { %v711_v21 = vld [vmem:[#allocation8] sm:$0xff]  ;;  %v1914_v22 = vpack.c.bf16 %v714_v20, %v712_v19  ;;  %v716_v24 = vld [vmem:[#allocation8 + $0x28] sm:$0xff]  ;;  %v844_v17 = vld [vmem:[#allocation10 + $0x18] sm:$0xff] }
  0xea   : > { %1841 = vmatpush3.bf16.msra.mxu0 %v1838_v32  ;;  %v1916_v26 = vpack.c.bf16 %v713_v23, %v711_v21  ;;  %v1918_v27 = vpack.c.bf16 %v718_v25, %v716_v24  ;;  %v715_v28 = vld [vmem:[#allocation8 + $0x20] sm:$0xff]  ;;  %v720_v30 = vld [vmem:[#allocation8 + $0x48] sm:$0xff] }
  0xeb   : > { %1843 = vmatprep.subr.bf16.mxu0 %v1842_v38  ;;  %1869 = vmatpush3.bf16.msra.mxu1 %v1866_v35  ;;  %v1920_v32 = vpack.c.bf16 %v717_v29, %v715_v28  ;;  %v1922_v33 = vpack.c.bf16 %v722_v31, %v720_v30  ;;  %v719_v34 = vld [vmem:[#allocation8 + $0x40] sm:$0xff]  ;;  %v721_v35 = vld [vmem:[#allocation8 + $0x50] sm:$0xff]  ;;  %v724_v36 = vld [vmem:[#allocation8 + $0x68] sm:$0xff] }
  0xec   : > { %1871 = vmatprep.subr.bf16.mxu1 %v1870_v41  ;;  %v1926_v39 = vpack.c.bf16 %v726_v37, %v724_v36  ;;  %v723_v40 = vld [vmem:[#allocation8 + $0x60] sm:$0xff]  ;;  %v732_v48 = vld [vmem:[#allocation8 + $0xa8] sm:$0xff]  ;;  %v847_v31 = vld [vmem:[#allocation10 + $0x30] sm:$0xff] }
  0xed   : > { %v731_v52 = vld [vmem:[#allocation8 + $0xa0] sm:$0xff]  ;;  %v736_v54 = vld [vmem:[#allocation8 + $0xc8] sm:$0xff]  ;;  %v851_v37 = vld [vmem:[#allocation10 + $0x50] sm:$0xff] }
  0xee   : > { %1845 = vmatpush3.bf16.msra.mxu0 %v1842_v38  ;;  %v1924_v38 = vpack.c.bf16 %v721_v35, %v719_v34  ;;  %v841_v13 = vld [vmem:[#allocation10] sm:$0xff]  ;;  %v842_v14 = vld [vmem:[#allocation10 + $0x8] sm:$0xff] }
  0xef   : > { %1847 = vmatprep.subr.bf16.mxu0 %v1846_v42  ;;  %1873 = vmatpush3.bf16.msra.mxu1 %v1870_v41  ;;  %v725_v41 = vld [vmem:[#allocation8 + $0x70] sm:$0xff]  ;;  %v1946_v16 = vpack.c.bf16 %v842_v14, %v841_v13  ;;  %v1425_v19 = vld [vmem:[%s2856_s6 + $0x2] ss:$0 sm:$0xff]  ;;  %v846_v29 = vld [vmem:[#allocation10 + $0x28] sm:$0xff] }
  0xf0   : > { %1875 = vmatprep.subr.bf16.mxu1 %v1874_v46  ;;  %v1928_v44 = vpack.c.bf16 %v725_v41, %v723_v40  ;;  %v845_v28 = vld [vmem:[#allocation10 + $0x20] sm:$0xff]  ;;  %v850_v35 = vld [vmem:[#allocation10 + $0x48] sm:$0xff] }
  0xf1   : > { %v1954_v30 = vpack.c.bf16 %v846_v29, %v845_v28  ;;  %v849_v34 = vld [vmem:[#allocation10 + $0x40] sm:$0xff]  ;;  %v854_v41 = vld [vmem:[#allocation10 + $0x68] sm:$0xff]  ;;  %v957_v28 = vld [vmem:[#allocation7 + $0x1b0] sm:$0xff] }
  0xf2   : > { %1849 = vmatpush3.bf16.msra.mxu0 %v1846_v42  ;;  %v728_v42 = vld [vmem:[#allocation8 + $0x88] sm:$0xff]  ;;  %v1962_v36 = vpack.c.bf16 %v850_v35, %v849_v34  ;;  %v1048_v34 = vld [vmem:[#allocation7 + $0x38] sm:$0xff] }
  0xf3   : > { %1877 = vmatpush3.bf16.msra.mxu1 %v1874_v46  ;;  %1883 = vmatprep.subr.bf16.mxu0 %v1882_v53  ;;  %v727_v46 = vld [vmem:[#allocation8 + $0x80] sm:$0xff]  ;;  %v1049_v35 = vld [vmem:[#allocation7 + $0x58] sm:$0xff] }
  0xf4   : > { %1879 = vmatprep.subr.bf16.mxu1 %v1878_v49  ;;  %v1932_v50 = vpack.c.bf16 %v729_v47, %v727_v46  ;;  %v944_v46 = vld [vmem:[#allocation7 + $0x10] sm:$0xff] }
  0xf5   : > { %1606 = vmatmul.mubr.f32.vlgmr.msra.gmra.mrb[0].mxu0 %v399_v43  ;;  %v730_v43 = vld [vmem:[#allocation8 + $0x98] sm:$0xff]  ;;  %v945_v47 = vld [vmem:[#allocation7 + $0x30] sm:$0xff] }
  0xf6   : > { %1885 = vmatpush3.bf16.msra.mxu0 %v1882_v53  ;;  %v1930_v45 = vpack.c.bf16 %v730_v43, %v728_v42  ;;  %v733_v53 = vld [vmem:[#allocation8 + $0xb0] sm:$0xff] }
  0xf7   : > { %1881 = vmatpush3.bf16.msra.mxu1 %v1878_v49  ;;  %1887 = vmatprep.subr.bf16.mxu0 %v1886_v55  ;;  %v734_v49 = vld [vmem:[#allocation8 + $0xb8] sm:$0xff]  ;;  %v1936_v56 = vpack.c.bf16 %v733_v53, %v731_v52  ;;  %v855_v43 = vld [vmem:[#allocation10 + $0x70] sm:$0xff] }
  0xf8   : > { %1915 = vmatprep.subr.bf16.mxu1 %v1914_v22  ;;  %v1934_v51 = vpack.c.bf16 %v734_v49, %v732_v48  ;;  %v946_v48 = vld [vmem:[#allocation7 + $0x50] sm:$0xff]  ;;  %v1978_v49 = vpack.c.bf16 %v945_v47, %v944_v46  ;;  %v1056_v46 = vld [vmem:[#allocation7 + $0x138] sm:$0xff] }
  0xf9   : > { %v948_v52 = vld [vmem:[#allocation7 + $0x90] sm:$0xff] }
  0xfa   : > { %1889 = vmatpush3.bf16.msra.mxu0 %v1886_v55  ;;  %v738_v55 = vld [vmem:[#allocation8 + $0xd8] sm:$0xff]  ;;  %v949_v53 = vld [vmem:[#allocation7 + $0xb0] sm:$0xff] }
  0xfb   : > { %1891 = vmatprep.subr.bf16.mxu0 %v1890_v58  ;;  %v1938_v57 = vpack.c.bf16 %v738_v55, %v736_v54  ;;  %v1986_v54 = vpack.c.bf16 %v949_v53, %v948_v52  ;;  %v950_v55 = vld [vmem:[#allocation7 + $0xd0] sm:$0xff] }
  0xfe   : > { %1893 = vmatpush3.bf16.msra.mxu0 %v1890_v58  ;;  %v1424_v58 = vld [vmem:[%s2856_s6 + $0x1] ss:$0 sm:$0xff] }
  0xff   : > { %1895 = vmatprep.subr.bf16.mxu0 %v1894_v61 }
 0x102   : > { %1897 = vmatpush3.bf16.msra.mxu0 %v1894_v61 }
 0x103   : > { %1899 = vmatprep.subr.bf16.mxu0 %v1898_v0 }
 0x106   : > { %1901 = vmatpush3.bf16.msra.mxu0 %v1898_v0 }
 0x107   : > { %1903 = vmatprep.subr.bf16.mxu0 %v1902_v3 }
 0x10a   : > { %1905 = vmatpush3.bf16.msra.mxu0 %v1902_v3  ;;  %v735_v3 = vld [vmem:[#allocation8 + $0xc0] sm:$0xff] }
 0x10b   : > { %1907 = vmatprep.subr.bf16.mxu0 %v1906_v15 }
 0x10e   : > { %1909 = vmatpush3.bf16.msra.mxu0 %v1906_v15  ;;  %v843_v15 = vld [vmem:[#allocation10 + $0x10] sm:$0xff] }
 0x10f   : > { %1911 = vmatprep.subr.bf16.mxu0 %v1910_v18 }
 0x112   : > { %1913 = vmatpush3.bf16.msra.mxu0 %v1910_v18  ;;  %v1950_v18 = vpack.c.bf16 %v844_v17, %v843_v15 }
 0x113   : > { %1947 = vmatprep.subr.bf16.mxu0 %v1946_v16 }
 0x1c8   : > { %v1607_v5 = vpop.f32.mrb[0].mxu0 }
 0x1c9   : > { %v496_v6 = vadd.f32 %v1607_v5, %v1423_v4  ;;  %v490_v7 = vpop.f32.mrb[1].mxu0 }
 0x1ca   : > { %v491_v8 = vadd.f32 %v1423_v4, %v490_v7  ;;  %v737_v4 = vld [vmem:[#allocation8 + $0xd0] sm:$0xff]  ;;  %v742_v7 = vld [vmem:[#allocation8 + $0xf8] sm:$0xff] }
 0x1cb   : > { %v502_v9 = vmul.f32 0.2, %v496_v6  ;;  %vm500_vm1 = vcmp.gt.f32.partialorder %v496_v6, 0.0  ;;  %v1940_v5 = vpack.c.bf16 %v737_v4, %v735_v3  ;;  %v393_v3 = vld [vmem:[%s2856_s6 + $0x3] sm:$0x3] }
 0x1cc   : > { %vm499_vm0 = vcmp.gt.f32.partialorder %v491_v8, 0.0  ;;  %v501_v10 = vmul.f32 0.2, %v491_v8 }
 0x1cd   : > { %v504_v12 = vsel %vm500_vm1, %v496_v6, %v502_v9  ;;  %v740_v6 = vld [vmem:[#allocation8 + $0xe8] sm:$0xff]  ;;  %v739_v9 = vld [vmem:[#allocation8 + $0xe0] sm:$0xff] }
 0x1ce   : > { %v503_v11 = vsel %vm499_vm0, %v491_v8, %v501_v10  ;;  %v1942_v8 = vpack.c.bf16 %v742_v7, %v740_v6  ;;  %v741_v10 = vld [vmem:[#allocation8 + $0xf0] sm:$0xff] }
 0x1cf   : > { %1640 = vmatprep.mubr.f32.mxu1 %v503_v11  ;;  %v1944_v11 = vpack.c.bf16 %v741_v10, %v739_v9 }
 0x1d0   : > { %1641 = vmatmul.mubr.f32.vlgmr.msra.gmra.mrb[0].mxu1 %v504_v12  ;;  %v2441_v12 = vmov 0.0  }
 0x1d1   : > { %1917 = vmatpush1.bf16.msra.mxu1 %v1916_v26  ;;  %818 = vmatprep.mubr.f32.mxu1 %v2441_v12 }
 0x1d2   : > { %1919 = vmatprep.subr.bf16.mxu1 %v1918_v27 }
 0x1d5   : > { %1921 = vmatpush1.bf16.msra.mxu1 %v1920_v32  ;;  %v848_v32 = vld [vmem:[#allocation10 + $0x38] sm:$0xff] }
 0x1d6   : > { %1923 = vmatprep.subr.bf16.mxu1 %v1922_v33  ;;  %v1958_v33 = vpack.c.bf16 %v848_v32, %v847_v31  ;;  %v959_v31 = vld [vmem:[#allocation7 + $0x1f0] sm:$0xff] }
 0x1d9   : > { %1925 = vmatpush1.bf16.msra.mxu1 %v1924_v38  ;;  %v852_v38 = vld [vmem:[#allocation10 + $0x58] sm:$0xff] }
 0x1da   : > { %1927 = vmatprep.subr.bf16.mxu1 %v1926_v39  ;;  %v853_v39 = vld [vmem:[#allocation10 + $0x60] sm:$0xff]  ;;  %v1966_v40 = vpack.c.bf16 %v852_v38, %v851_v37  ;;  %v1050_v37 = vld [vmem:[#allocation7 + $0x78] sm:$0xff] }
 0x1db   : > { %v1970_v42 = vpack.c.bf16 %v854_v41, %v853_v39  ;;  %v2014_v38 = vpack.c.bf16 %v1050_v37, %v1049_v35  ;;  %v1051_v39 = vld [vmem:[#allocation7 + $0x98] sm:$0xff]  ;;  %v1428_v35 = vld [vmem:[%s2856_s6 + $0x7] ss:$0 sm:$0xff] }
 0x1dd   : > { %1929 = vmatpush1.bf16.msra.mxu1 %v1928_v44  ;;  %v856_v44 = vld [vmem:[#allocation10 + $0x78] sm:$0xff] }
 0x1de   : > { %1931 = vmatprep.subr.bf16.mxu1 %v1930_v45  ;;  %v1974_v45 = vpack.c.bf16 %v856_v44, %v855_v43  ;;  %v1054_v43 = vld [vmem:[#allocation7 + $0xf8] sm:$0xff] }
 0x1e1   : > { %1933 = vmatpush1.bf16.msra.mxu1 %v1932_v50  ;;  %v947_v50 = vld [vmem:[#allocation7 + $0x70] sm:$0xff] }
 0x1e2   : > { %1935 = vmatprep.subr.bf16.mxu1 %v1934_v51  ;;  %v1982_v51 = vpack.c.bf16 %v947_v50, %v946_v48  ;;  %v1057_v48 = vld [vmem:[#allocation7 + $0x158] sm:$0xff] }
 0x1e5   : > { %1937 = vmatpush1.bf16.msra.mxu1 %v1936_v56  ;;  %v951_v56 = vld [vmem:[#allocation7 + $0xf0] sm:$0xff] }
 0x1e6   : > { %1939 = vmatprep.subr.bf16.mxu1 %v1938_v57  ;;  %v1990_v57 = vpack.c.bf16 %v951_v56, %v950_v55 }
 0x1e9   : > { %1941 = vmatpush1.bf16.msra.mxu1 %v1940_v5 }
 0x1ea   : > { %1943 = vmatprep.subr.bf16.mxu1 %v1942_v8 }
 0x1ed   : > { %1945 = vmatpush1.bf16.msra.mxu1 %v1944_v11 }
 0x1ee   : > { %1979 = vmatprep.subr.bf16.mxu1 %v1978_v49 }
 0x2a3   : > { %v1642_v59 = vpop.f32.mrb[0].mxu1 }
 0x2a4   : > { %v599_v60 = vadd.f32 %v1642_v59, %v1424_v58  ;;  %v593_v61 = vpop.f32.mrb[1].mxu1  ;;  %v953_v59 = vld [vmem:[#allocation7 + $0x130] sm:$0xff] }
 0x2a5   : > { %v594_v62 = vadd.f32 %v1424_v58, %v593_v61  ;;  %v952_v58 = vld [vmem:[#allocation7 + $0x110] sm:$0xff] }
 0x2a6   : > { %v605_v63 = vmul.f32 0.2, %v599_v60  ;;  %vm603_vm2 = vcmp.gt.f32.partialorder %v599_v60, 0.0  ;;  %v954_v61 = vld [vmem:[#allocation7 + $0x150] sm:$0xff] }
 0x2a7   : > { %v604_v0 = vmul.f32 0.2, %v594_v62  ;;  %vm602_vm3 = vcmp.gt.f32.partialorder %v594_v62, 0.0 }
 0x2a8   : > { %v607_v2 = vsel %vm603_vm2, %v599_v60, %v605_v63  ;;  %v1994_v60 = vpack.c.bf16 %v953_v59, %v952_v58 }
 0x2a9   : > { %v606_v1 = vsel %vm602_vm3, %v594_v62, %v604_v0  ;;  %v955_v62 = vld [vmem:[#allocation7 + $0x170] sm:$0xff]  ;;  %v744_v0 = vlaneseq }
 0x2aa   : > { %1675 = vmatprep.mubr.f32.mxu0 %v606_v1  ;;  %v1998_v63 = vpack.c.bf16 %v955_v62, %v954_v61  ;;  %v1060_v61 = vld [vmem:[#allocation7 + $0x1b8] sm:$0xff] }
 0x2ab   : > { %1676 = vmatmul.mubr.f32.vlgmr.msra.gmra.mrb[2].mxu0 %v607_v2  ;;  %v745_v1 = vshrl.u32 %v744_v0, 7  ;;  %v1062_v0 = vld [vmem:[#allocation7 + $0x1f8] sm:$0xff] }
 0x2ac   : > { %1949 = vmatpush3.bf16.msra.mxu0 %v1946_v16 }
 0x2ad   : > { %1951 = vmatprep.subr.bf16.mxu0 %v1950_v18  ;;  %v746_v2 = vsub.s32 0, %v745_v1  ;;  %v750_v4 = vsub.s32 1, %v745_v1 }
 0x2af   : > { %v747_v5 = vrot.slane %v393_v3, %v746_v2  ;;  %v751_v6 = vrot.slane %v393_v3, %v750_v4  ;;  %v1150_v2 = vld [vmem:[#allocation11] sm:$0xff]  ;;  %v1151_v3 = vld [vmem:[#allocation11 + $0x8] sm:$0xff]  ;;  %v1152_v4 = vld [vmem:[#allocation11 + $0x10] sm:$0xff] }
 0x2b0   : > { %1953 = vmatpush3.bf16.msra.mxu0 %v1950_v18 }
 0x2b1   : > { %1955 = vmatprep.subr.bf16.mxu0 %v1954_v30 }
 0x2b4   : > { %1957 = vmatpush3.bf16.msra.mxu0 %v1954_v30  ;;  %v958_v30 = vld [vmem:[#allocation7 + $0x1d0] sm:$0xff] }
 0x2b5   : > { %1959 = vmatprep.subr.bf16.mxu0 %v1958_v33  ;;  %v2006_v32 = vpack.c.bf16 %v959_v31, %v958_v30  ;;  %v1163_v30 = vld [vmem:[#allocation11 + $0x68] sm:$0xff] }
 0x2b8   : > { %1961 = vmatpush3.bf16.msra.mxu0 %v1958_v33  ;;  %v1047_v33 = vld [vmem:[#allocation7 + $0x18] sm:$0xff] }
 0x2b9   : > { %1963 = vmatprep.subr.bf16.mxu0 %v1962_v36 }
 0x2bc   : > { %1965 = vmatpush3.bf16.msra.mxu0 %v1962_v36  ;;  %v2010_v36 = vpack.c.bf16 %v1048_v34, %v1047_v33  ;;  %v1165_v33 = vld [vmem:[#allocation11 + $0x78] sm:$0xff] }
 0x2bd   : > { %1967 = vmatprep.subr.bf16.mxu0 %v1966_v40 }
 0x2c0   : > { %1969 = vmatpush3.bf16.msra.mxu0 %v1966_v40  ;;  %v1052_v40 = vld [vmem:[#allocation7 + $0xb8] sm:$0xff] }
 0x2c1   : > { %1971 = vmatprep.subr.bf16.mxu0 %v1970_v42  ;;  %v2018_v41 = vpack.c.bf16 %v1052_v40, %v1051_v39 }
 0x2c4   : > { %1973 = vmatpush3.bf16.msra.mxu0 %v1970_v42  ;;  %v1053_v42 = vld [vmem:[#allocation7 + $0xd8] sm:$0xff] }
 0x2c5   : > { %1975 = vmatprep.subr.bf16.mxu0 %v1974_v45  ;;  %v2022_v44 = vpack.c.bf16 %v1054_v43, %v1053_v42 }
 0x2c8   : > { %1977 = vmatpush3.bf16.msra.mxu0 %v1974_v45  ;;  %v1055_v45 = vld [vmem:[#allocation7 + $0x118] sm:$0xff] }
 0x2c9   : > { %2011 = vmatprep.subr.bf16.mxu0 %v2010_v36  ;;  %v2026_v47 = vpack.c.bf16 %v1056_v46, %v1055_v45 }
 0x37e   : > { %v1677_v20 = vpop.f32.mrb[2].mxu0 }
 0x37f   : > { %v696_v21 = vpop.f32.mrb[3].mxu0  ;;  %v702_v22 = vadd.f32 %v1677_v20, %v1425_v19 }
 0x380   : > { %v697_v23 = vadd.f32 %v1425_v19, %v696_v21  ;;  %v400_v19 = vld [vmem:[%s2730_s22 + $0x8] sm:$0xff] }
 0x381   : > { %v708_v25 = vmul.f32 0.2, %v702_v22  ;;  %vm706_vm5 = vcmp.gt.f32.partialorder %v702_v22, 0.0 }
 0x382   : > { %vm705_vm4 = vcmp.gt.f32.partialorder %v697_v23, 0.0  ;;  %v707_v24 = vmul.f32 0.2, %v697_v23 }
 0x383   : > { %v710_v27 = vsel %vm706_vm5, %v702_v22, %v708_v25  ;;  %v401_v22 = vld [vmem:[%s2730_s22 + $0x18] sm:$0xff] }
 0x384   : > { %v709_v26 = vsel %vm705_vm4, %v697_v23, %v707_v24 }
 0x385   : > { %819 = vmatmul.mubr.f32.vlgmr.msra.gmra.mrb[2].mxu1 %v709_v26 }
 0x386   : > { %824 = vmatprep.mubr.f32.mxu1 %v2441_v12  ;;  %1981 = vmatpush3.bf16.msra.mxu1 %v1978_v49  ;;  %v1058_v49 = vld [vmem:[#allocation7 + $0x178] sm:$0xff] }
 0x387   : > { %1983 = vmatprep.subr.bf16.mxu1 %v1982_v51  ;;  %v2030_v50 = vpack.c.bf16 %v1058_v49, %v1057_v48 }
 0x389   : > { %825 = vmatmul.mubr.f32.gmra.mrb[4].mxu1 %v710_v27  ;;  %v956_v27 = vld [vmem:[#allocation7 + $0x190] sm:$0xff] }
 0x38a   : > { %1985 = vmatpush3.bf16.msra.mxu1 %v1982_v51  ;;  %v2002_v29 = vpack.c.bf16 %v957_v28, %v956_v27  ;;  %v1426_v51 = vld [vmem:[%s2856_s6 + $0x5] ss:$0 sm:$0xff] }
 0x38b   : > { %1987 = vmatprep.subr.bf16.mxu1 %v1986_v54 }
 0x38e   : > { %1989 = vmatpush3.bf16.msra.mxu1 %v1986_v54 }
 0x38f   : > { %1991 = vmatprep.subr.bf16.mxu1 %v1990_v57 }
 0x392   : > { %1993 = vmatpush3.bf16.msra.mxu1 %v1990_v57 }
 0x393   : > { %1995 = vmatprep.subr.bf16.mxu1 %v1994_v60 }
 0x396   : > { %1997 = vmatpush3.bf16.msra.mxu1 %v1994_v60  ;;  %v1059_v60 = vld [vmem:[#allocation7 + $0x198] sm:$0xff] }
 0x397   : > { %1999 = vmatprep.subr.bf16.mxu1 %v1998_v63  ;;  %v2034_v62 = vpack.c.bf16 %v1060_v61, %v1059_v60 }
 0x39a   : > { %2001 = vmatpush3.bf16.msra.mxu1 %v1998_v63  ;;  %v1061_v63 = vld [vmem:[#allocation7 + $0x1d8] sm:$0xff] }
 0x39b   : > { %2003 = vmatprep.subr.bf16.mxu1 %v2002_v29  ;;  %v2038_v1 = vpack.c.bf16 %v1062_v0, %v1061_v63 }
 0x39e   : > { %2005 = vmatpush3.bf16.msra.mxu1 %v2002_v29  ;;  %v1162_v29 = vld [vmem:[#allocation11 + $0x60] sm:$0xff] }
 0x39f   : > { %2007 = vmatprep.subr.bf16.mxu1 %v2006_v32  ;;  %v2066_v31 = vpack.c.bf16 %v1163_v30, %v1162_v29 }
 0x3a2   : > { %2009 = vmatpush3.bf16.msra.mxu1 %v2006_v32  ;;  %v1164_v32 = vld [vmem:[#allocation11 + $0x70] sm:$0xff] }
 0x3a3   : > { %v2070_v34 = vpack.c.bf16 %v1165_v33, %v1164_v32 }
 0x458   : > { %v820_v7 = vpop.f32.mrb[2].mxu1 }
 0x459   : > { %v821_v8 = vadd.f32 %v820_v7, %v747_v5  ;;  %v822_v9 = vpop.f32.mrb[3].mxu1 }
 0x45a   : > { %v823_v10 = vadd.f32 %v822_v9, %v751_v6  ;;  %v1155_v9 = vld [vmem:[#allocation11 + $0x28] sm:$0xff] }
 0x45b   : > { %1251 = vst [vmem:[%s2763_s14 + $0x10] sm:$0xff] %v821_v8 }
 0x45c   : > { %v831_v11 = vmul.f32 0.5, %v823_v10  ;;  %1253 = vst [vmem:[%s2763_s14 + $0x18] sm:$0xff] %v823_v10  ;;  %v826_v12 = vpop.f32.mrb[4].mxu1 }
 0x45d   : > { %v827_v13 = vadd.f32 %v826_v12, %v747_v5  ;;  %v828_v14 = vpop.f32.mrb[5].mxu1  ;;  %v2042_v5 = vpack.c.bf16 %v1151_v3, %v1150_v2  ;;  %v1157_v12 = vld [vmem:[#allocation11 + $0x38] sm:$0xff] }
 0x45e   : > { %v833_v15 = vmul.f32 1.442695, %v831_v11  ;;  %v829_v16 = vadd.f32 %v828_v14, %v751_v6  ;;  %v1153_v6 = vld [vmem:[#allocation11 + $0x18] sm:$0xff]  ;;  %v1156_v11 = vld [vmem:[#allocation11 + $0x30] sm:$0xff]  ;;  %v1158_v14 = vld [vmem:[#allocation11 + $0x40] sm:$0xff] }
 0x45f   : > { %1252 = vst [vmem:[%s2763_s14 + $0x30] sm:$0xff] %v827_v13  ;;  %v2046_v7 = vpack.c.bf16 %v1153_v6, %v1152_v4  ;;  %2043 = vmatprep.subr.bf16.mxu1 %v2042_v5 }
 0x460   : > { %2175 = vpow2.f32 %v833_v15  ;;  %v832_v17 = vmul.f32 0.5, %v829_v16  ;;  %1254 = vst [vmem:[%s2763_s14 + $0x38] sm:$0xff] %v829_v16  ;;  %v1159_v15 = vld [vmem:[#allocation11 + $0x48] sm:$0xff] }
 0x461   : > { %v2058_v16 = vpack.c.bf16 %v1159_v15, %v1158_v14 }
 0x462   : > { %v835_v18 = vmul.f32 1.442695, %v832_v17  ;;  %v1160_v17 = vld [vmem:[#allocation11 + $0x50] sm:$0xff] }
 0x464   : > { %2177 = vpow2.f32 %v835_v18  ;;  %v1161_v18 = vld [vmem:[#allocation11 + $0x58] sm:$0xff] }
 0x46a   : > { %v2176_v20 = vpop.eup %2175 }
 0x46b   : > { %v837_v21 = vmul.f32 %v2176_v20, %v400_v19  ;;  %v2062_v19 = vpack.c.bf16 %v1161_v18, %v1160_v17  ;;  %v1427_v20 = vld [vmem:[%s2856_s6 + $0x6] ss:$0 sm:$0xff] }
 0x46d   : > { %v839_v23 = vadd.f32 %v837_v21, %v821_v8  ;;  %v1154_v8 = vld [vmem:[#allocation11 + $0x20] sm:$0xff] }
 0x46e   : > { %v2178_v24 = vpop.eup %2177  ;;  %v2050_v10 = vpack.c.bf16 %v1155_v9, %v1154_v8 }
 0x46f   : > { %1710 = vmatprep.mubr.f32.mxu0 %v839_v23  ;;  %1249 = vst [vmem:[%s2763_s14 + $0x8] sm:$0xff] %v839_v23  ;;  %v838_v25 = vmul.f32 %v2178_v24, %v401_v22 }
 0x471   : > { %v840_v26 = vadd.f32 %v838_v25, %v827_v13  ;;  %v2054_v13 = vpack.c.bf16 %v1157_v12, %v1156_v11 }
 0x473   : > { %1711 = vmatmul.mubr.f32.vlgmr.msra.gmra.mrb[4].mxu0 %v840_v26  ;;  %1250 = vst [vmem:[%s2763_s14 + $0x28] sm:$0xff] %v840_v26 }
 0x474   : > { %2013 = vmatpush3.bf16.msra.mxu0 %v2010_v36 }
 0x475   : > { %2015 = vmatprep.subr.bf16.mxu0 %v2014_v38 }
 0x478   : > { %2017 = vmatpush3.bf16.msra.mxu0 %v2014_v38 }
 0x479   : > { %2019 = vmatprep.subr.bf16.mxu0 %v2018_v41 }
 0x47c   : > { %2021 = vmatpush3.bf16.msra.mxu0 %v2018_v41 }
 0x47d   : > { %2023 = vmatprep.subr.bf16.mxu0 %v2022_v44 }
 0x480   : > { %2025 = vmatpush3.bf16.msra.mxu0 %v2022_v44  ;;  %v1429_v44 = vld [vmem:[%s2856_s6 + $0x8] ss:$0 sm:$0xff] }
 0x481   : > { %2027 = vmatprep.subr.bf16.mxu0 %v2026_v47 }
 0x484   : > { %2029 = vmatpush3.bf16.msra.mxu0 %v2026_v47 }
 0x485   : > { %2031 = vmatprep.subr.bf16.mxu0 %v2030_v50 }
 0x488   : > { %2033 = vmatpush3.bf16.msra.mxu0 %v2030_v50 }
 0x489   : > { %2035 = vmatprep.subr.bf16.mxu0 %v2034_v62 }
 0x48c   : > { %2037 = vmatpush3.bf16.msra.mxu0 %v2034_v62 }
 0x48d   : > { %2039 = vmatprep.subr.bf16.mxu0 %v2038_v1 }
 0x490   : > { %2041 = vmatpush3.bf16.msra.mxu0 %v2038_v1 }
 0x546   : > { %v1712_v52 = vpop.f32.mrb[4].mxu0 }
 0x547   : > { %v935_v53 = vadd.f32 %v1712_v52, %v1426_v51  ;;  %v929_v54 = vpop.f32.mrb[5].mxu0 }
 0x548   : > { %v930_v55 = vadd.f32 %v1426_v51, %v929_v54 }
 0x549   : > { %v941_v56 = vmul.f32 0.2, %v935_v53  ;;  %vm939_vm6 = vcmp.gt.f32.partialorder %v935_v53, 0.0 }
 0x54a   : > { %v940_v57 = vmul.f32 0.2, %v930_v55  ;;  %vm938_vm7 = vcmp.gt.f32.partialorder %v930_v55, 0.0 }
 0x54b   : > { %v943_v59 = vsel %vm939_vm6, %v935_v53, %v941_v56 }
 0x54c   : > { %v942_v58 = vsel %vm938_vm7, %v930_v55, %v940_v57 }
 0x54d   : > { %1745 = vmatprep.mubr.f32.mxu1 %v942_v58 }
 0x54e   : > { %1746 = vmatmul.mubr.f32.vlgmr.msra.gmra.mrb[6].mxu1 %v943_v59 }
 0x54f   : > { %2045 = vmatpush3.bf16.msra.mxu1 %v2042_v5 }
 0x550   : > { %2047 = vmatprep.subr.bf16.mxu1 %v2046_v7 }
 0x553   : > { %2049 = vmatpush3.bf16.msra.mxu1 %v2046_v7 }
 0x554   : > { %2051 = vmatprep.subr.bf16.mxu1 %v2050_v10 }
 0x557   : > { %2053 = vmatpush3.bf16.msra.mxu1 %v2050_v10 }
 0x558   : > { %2055 = vmatprep.subr.bf16.mxu1 %v2054_v13 }
 0x55b   : > { %2057 = vmatpush3.bf16.msra.mxu1 %v2054_v13 }
 0x55c   : > { %2059 = vmatprep.subr.bf16.mxu1 %v2058_v16 }
 0x55f   : > { %2061 = vmatpush3.bf16.msra.mxu1 %v2058_v16 }
 0x560   : > { %2063 = vmatprep.subr.bf16.mxu1 %v2062_v19 }
 0x563   : > { %2065 = vmatpush3.bf16.msra.mxu1 %v2062_v19 }
 0x564   : > { %2067 = vmatprep.subr.bf16.mxu1 %v2066_v31 }
 0x567   : > { %2069 = vmatpush3.bf16.msra.mxu1 %v2066_v31 }
 0x568   : > { %2071 = vmatprep.subr.bf16.mxu1 %v2070_v34 }
 0x56b   : > { %2073 = vmatpush3.bf16.msra.mxu1 %v2070_v34 }
 0x621   : > { %v1747_v21 = vpop.f32.mrb[6].mxu1 }
 0x622   : > { %v1038_v22 = vadd.f32 %v1747_v21, %v1427_v20  ;;  %v1032_v23 = vpop.f32.mrb[7].mxu1 }
 0x623   : > { %v1033_v24 = vadd.f32 %v1427_v20, %v1032_v23 }
 0x624   : > { %v1044_v25 = vmul.f32 0.2, %v1038_v22  ;;  %vm1042_vm8 = vcmp.gt.f32.partialorder %v1038_v22, 0.0 }
 0x625   : > { %v1043_v26 = vmul.f32 0.2, %v1033_v24  ;;  %vm1041_vm9 = vcmp.gt.f32.partialorder %v1033_v24, 0.0 }
 0x626   : > { %v1046_v28 = vsel %vm1042_vm8, %v1038_v22, %v1044_v25 }
 0x627   : > { %v1045_v27 = vsel %vm1041_vm9, %v1033_v24, %v1043_v26 }
 0x628   : > { %1780 = vmatprep.mubr.f32.mxu0 %v1045_v27 }
 0x629   : > { %1781 = vmatmul.mubr.f32.vlgmr.msra.gmra.mrb[6].mxu0 %v1046_v28 }
 0x6fc   : > { %v1782_v36 = vpop.f32.mrb[6].mxu0 }
 0x6fd   : > { %v1141_v37 = vadd.f32 %v1782_v36, %v1428_v35  ;;  %v1135_v38 = vpop.f32.mrb[7].mxu0 }
 0x6fe   : > { %v1136_v39 = vadd.f32 %v1428_v35, %v1135_v38 }
 0x6ff   : > { %v1147_v40 = vmul.f32 0.2, %v1141_v37  ;;  %vm1145_vm10 = vcmp.gt.f32.partialorder %v1141_v37, 0.0 }
 0x700   : > { %v1146_v41 = vmul.f32 0.2, %v1136_v39  ;;  %vm1144_vm11 = vcmp.gt.f32.partialorder %v1136_v39, 0.0 }
 0x701   : > { %v1149_v43 = vsel %vm1145_vm10, %v1141_v37, %v1147_v40 }
 0x702   : > { %v1148_v42 = vsel %vm1144_vm11, %v1136_v39, %v1146_v41 }
 0x703   : > { %1815 = vmatprep.mubr.f32.mxu1 %v1148_v42 }
 0x704   : > { %1816 = vmatmul.mubr.f32.vlgmr.msra.gmra.mrb[8].mxu1 %v1149_v43 }
 0x7d5   : > { %1262 = sbr.rel (!%p2893_p5) target bundleno = 2040 (0x7f8), region = 76 }
 0x7d7   : > { %v1817_v45 = vpop.f32.mrb[8].mxu1 }
 0x7d8   : > { %v1244_v46 = vadd.f32 %v1817_v45, %v1429_v44  ;;  %v1238_v47 = vpop.f32.mrb[9].mxu1 }
 0x7d9   : > { %v1239_v48 = vadd.f32 %v1429_v44, %v1238_v47 }
 0x7da   : > { %1248 = vst [vmem:[%s2763_s14 + $0x20] sm:$0xff] %v1244_v46 }
 0x7db   : > { %1247 = vst [vmem:[%s2763_s14] sm:$0xff] %v1239_v48 }
 0x7dc   : > { %s2905_s19 = smov (!%p1265_p6, %s1264_s19), 2 }
 0x7dd   : > { %s2791_s30 = sshll.u32 %s2905_s19, 9 }
 0x7de   : > { %s1270_s20 = ssub.s32 1024, %s2791_s30 }
 0x7df   : > { %1271 = vsyncadd %s1256_s12, %s1270_s20  ;;  %p1434_p11 = scmp.ne.s32.totalorder %s2791_s30, 0  ;;  %s1446_s13 = sshll.u32 %s2506_s28, 10 }
 0x7e0   : > { %s2801_s9 = scalar_lea.hbm %s2857_s7, %s1446_s13  ;;  %s1277_s18 = sshll.u32 %s2763_s14, 4  ;;  %s2804_s18 = int_to_ptr.vmem [resolvable:$true] %s1277_s18 }
 0x7e1   : > { %s2347_s16 = scalar_lea.vmem %s2804_s18, %s2791_s30  ;;  %s2442_s23 = smov [#allocation13]  }
 0x7e2   : > { %p2348_p13 = scmp.ne.s32.totalorder %s2804_s18, %s2347_s16  ;;  %s2351_s29 = sshll.u32 %s2442_s23, 4  ;;  %s2352_s29 = int_to_ptr.vmem [resolvable:$false] %s2351_s29 }
 0x7e3   : > { %s2353_s28 = scalar_lea.vmem %s2352_s29, 2048  ;;  %p2354_p7 = scmp.lt.s32.totalorder %s2804_s18, %s2352_s29 }
 0x7e4   : > { %p2349_p0 = pnand %p2348_p13, %p1434_p11  ;;  %p2355_p2 = scmp.lt.s32.totalorder %s2353_s28, %s2347_s16 }
 0x7e6   : > { %p2350_p12 = pneg %p2349_p0  ;;  %p2356_p8 = por %p2355_p2, %p2354_p7 }
 0x7e8   : > { %p2357_p9 = pnand %p2356_p8, %p2350_p12 }
 0x7ea   : > { %2360 = shalt.err (!%p2357_p9)
}
 0x7eb   : > { %s2361_s14 = scalar_lea.hbm %s2801_s9, %s2791_s30  ;;  %s2365_s8 = scalar_lea.hbm %s2857_s7, 1536 }
 0x7ec   : > { %p2362_p10 = scmp.ne.s32.totalorder %s2801_s9, %s2361_s14  ;;  %p2366_p5 = scmp.lt.u32.totalorder %s2801_s9, %s2857_s7 }
 0x7ed   : > { %p2367_p6 = scmp.lt.u32.totalorder %s2365_s8, %s2361_s14  ;;  %p2369_p0 = scmp.lt.u32.totalorder %s2361_s14, %s2801_s9 }
 0x7ee   : > { %p2363_p1 = pnand %p2362_p10, %p1434_p11 }
 0x7ef   : > { %p2368_p13 = por %p2367_p6, %p2366_p5 }
 0x7f0   : > { %p2364_p4 = pneg %p2363_p1 }
 0x7f1   : > { %p2370_p12 = por %p2369_p0, %p2368_p13 }
 0x7f3   : > { %p2371_p7 = pnand %p2370_p12, %p2364_p4 }
 0x7f5   : > { %2374 = shalt.err (!%p2371_p7)
}
 0x7f6   : > { %s2443_s15 = smov 512   ;;  %s2444_s19 = smov 32  }
 0x7f7   : > { %1283 = dma.vmem_to_hbm [thread:$0]  (%p1434_p11), %s2804_s18, %s2791_s30, %s2801_s9, %s1256_s12, %s2443_s15, %s2443_s15, %s2444_s19  }
 0x7f8 PF: > { %s2894_s20 = sld [smem:[#allocation19_spill]]  ;;  %s2895_s13 = sld [smem:[#allocation22_spill]] }
 0x7fe   : > { %s1292_s1 = sand.u32 1, %s2894_s20   ;;  %p2896_p2 = scmp.ne.s32.totalorder %s2895_s13, 0 }
 0x7ff   : > { %s1293_s24 = scalar_lea.sflag [#allocation4], %s1292_s1 }
 0x800   : > { %p2113_p8 = pnand %p1405_p3, %p2896_p2 }
 0x802   : > { %2408 = dma.done.wait (!%p2113_p8), %s1293_s24, 1024  }
 0x803   : > { %2410 = vsyncadd (!%p2113_p8), %s1293_s24, 4294966272  ;;  %s2897_s27 = sld [smem:[#allocation20_spill]]  ;;  %s2898_s16 = sld [smem:[#allocation21_spill]] }
 0x804   : > { %s2899_s24 = smov %s2417_s25  ;;  %s2900_s25 = smov %s2421_s26 }
 0x809   : > { %p23_p9 = scmp.ge.s32.totalorder %s2897_s27, 4   ;;  %s2901_s26 = smov %s2898_s16 }
 0x80b   :  { %25 = sbr.rel (!%p23_p9) target bundleno = 10 (0xa), region = 113 }
 0x812   :  { %1298 = vsyncpa [#allocation3], 1 }
 0x813   :  { %1300 = vsyncpa [#allocation3 + $0x1], 1 }
 0x814   :  { %1301 = vsyncpa [#allocation6], 1 }
 0x815   :  { %1302 = vsyncpa [#allocation9], 1 }
 0x816   :  { %1303 = vsyncpa [#allocation12], 1 }
 0x817   :  { %1304 = vsyncpa [#allocation4], 1 }
 0x818   :  { %1306 = vsyncpa [#allocation4 + $0x1], 1 }

// kernel: tpu_custom_call.1
= control target key start
LH: loop header
LB: loop body
LE: loop exit
PB: predicated region body
PF: predicated region fallthrough
CT: control target
= control target key end

     0   :  { %s2850_s0 = inlined_call_operand.hbm [shape: f32[24,256], index: 0, kind: input, shape index: {}]   ;;  %s2851_s1 = inlined_call_operand.hbm [shape: f32[128,128], index: 1, kind: input, shape index: {}]   ;;  %s2852_s2 = inlined_call_operand.hbm [shape: f32[128,512], index: 2, kind: input, shape index: {}]   ;;  %s2853_s3 = inlined_call_operand.hbm [shape: f32[128,256], index: 3, kind: input, shape index: {}]   ;;  %s2854_s4 = inlined_call_operand.hbm [shape: f32[128,128], index: 4, kind: input, shape index: {}]   ;;  %s2855_s5 = inlined_call_operand.hbm [shape: f32[128,128], index: 5, kind: input, shape index: {}]   ;;  %s2856_s6 = inlined_call_operand.vmem [shape: f32[1,1152], index: 6, kind: input, shape index: {}]   ;;  %s2857_s7 = inlined_call_operand.hbm [shape: f32[24,512], index: 7, kind: output, shape index: {}]  }
   0x1   :  { %2869 = sst [smem:[#allocation23_spill]] %s2851_s1 }
   0x2   :  { %12 = vsyncpa [#allocation3], 0 }
   0x3   :  { %14 = vsyncpa [#allocation3 + $0x1], 0 }
   0x4   :  { %15 = vsyncpa [#allocation6], 0 }
   0x5   :  { %16 = vsyncpa [#allocation9], 0 }
   0x6   :  { %17 = vsyncpa [#allocation12], 0 }
   0x7   :  { %18 = vsyncpa [#allocation4], 0 }
   0x8   :  { %20 = vsyncpa [#allocation4 + $0x1], 0  ;;  %s2485_s24 = smov 0   ;;  %s2487_s25 = smov 0  }
   0x9   :  { %s2489_s26 = smov 0   ;;  %s2491_s27 = smov 0  }
   0xa LB: > { %2870 = sst [smem:[#allocation19_spill]] %s2413_s24  ;;  %s2506_s28 = sadd.s32 4294967295, %s2425_s27   ;;  %s2425_s27 = sphi %s2491_s27, %s2897_s27   ;;  %s2421_s26 = sphi %s2489_s26, %s2901_s26   ;;  %s2417_s25 = sphi %s2487_s25, %s2900_s25   ;;  %s2413_s24 = sphi %s2485_s24, %s2899_s24  }
   0xb   : > { %s1398_s29 = sadd.s32 4294967294, %s2425_s27   ;;  %s2510_s30 = sadd.s32 1, %s2425_s27  }
   0xc   : > { %2871 = sst [smem:[#allocation20_spill]] %s2510_s30  ;;  %s33_s8 = sadd.s32 1, %s2421_s26 }
   0xd   : > { %s30_s9 = ssub.s32 %s2425_s27, %s2510_s30  ;;  %p40_p0 = scmp.ne.s32.totalorder %s2421_s26, %s2417_s25 }
   0xe   : > { %p31_p1 = scmp.eq.s32.totalorder %s30_s9, 0  ;;  %p41_p2 = scmp.eq.s32.totalorder %s2425_s27, 0 }
   0xf   : > { %p46_p3 = scmp.ne.s32.totalorder %s2417_s25, %s2413_s24  ;;  %p2858_p4 = scmp.eq.s32.totalorder %s2506_s28, 0 }
  0x10   : > { %s2522_s10 = scalar_select %p31_p1, %s2421_s26, %s33_s8  }
  0x11   : > { %p2524_p5 = por %p41_p2, %p40_p0  ;;  %p2530_p6 = por %p2858_p4, %p46_p3 }
  0x12   : > { %2872 = sst [smem:[#allocation21_spill]] %s2522_s10  ;;  %p196_p7 = scmp.eq.s32.totalorder %s2506_s28, 1 }
  0x13   : > { %s2873_s11 = scalar_select %p2524_p5, 1, 0 }
  0x14   : > { %s2874_s12 = scalar_select %p2530_p6, 1, 0 }
  0x15   : > { %p202_p8 = scmp.eq.s32.totalorder %s1398_s29, 1  ;;  %p1399_p9 = scmp.ge.s32.totalorder %s2425_s27, 1 }
  0x16   : > { %p209_p10 = scmp.lt.s32.totalorder %s2425_s27, 3  ;;  %p2537_p11 = por %p196_p7, %p40_p0 }
  0x17   : > { %p2541_p12 = por %p202_p8, %p46_p3  ;;  %s2427_s16 = smov [#allocation5]  }
  0x18   : > { %s2875_s13 = scalar_select %p2537_p11, 1, 0 }
  0x19   : > { %s2876_s14 = scalar_select %p2541_p12, 1, 0 }
  0x1a   : > { %p2545_p13 = pnand %p1399_p9, %p209_p10  ;;  %s221_s17 = sshll.u32 %s2427_s16, 4  ;;  %s222_s17 = int_to_ptr.vmem [resolvable:$true] %s221_s17 }
  0x1b   : > { %2877 = sst [smem:[#allocation22_spill]] %s2876_s14  ;;  %s2428_s19 = smov [#allocation8]  }
  0x1c   : > { %s2878_s15 = scalar_select %p2545_p13, 1, 0 }
  0x1d   : > { %p2096_p1 = pneg %p2545_p13  ;;  %s247_s20 = sshll.u32 %s2428_s19, 4  ;;  %s2557_s20 = int_to_ptr.vmem [resolvable:$true] %s247_s20 }
  0x1e   : > { %s2880_s1 = sld [smem:[#allocation23_spill]] }
  0x1f   : > { %p2553_p2 = pnand %p2096_p1, %p2858_p4 }
  0x21   : > { %p2567_p3 = pneg %p2553_p2 }
  0x24   : > { %s2179_s23 = scalar_lea.hbm %s2880_s1, 2048 }
  0x25   : > { %p2180_p0 = scmp.ne.s32.totalorder %s2880_s1, %s2179_s23  ;;  %p2186_p9 = scmp.lt.u32.totalorder %s2179_s23, %s2880_s1 }
  0x27   : > { %p2182_p7 = pnand %p2567_p3, %p2180_p0 }
  0x29   : > { %p2183_p8 = pneg %p2182_p7 }
  0x2b   : > { %p2188_p10 = pnand %p2186_p9, %p2183_p8 }
  0x2d   : > { %2191 = shalt.err (!%p2188_p10)
}
  0x2e   : > { %s2192_s21 = scalar_lea.vmem %s222_s17, 2048  ;;  %p2200_p11 = scmp.lt.s32.totalorder %s222_s17, %s222_s17 }
  0x2f   : > { %p2193_p1 = scmp.ne.s32.totalorder %s222_s17, %s2192_s21  ;;  %p2201_p6 = scmp.lt.s32.totalorder %s2192_s21, %s2192_s21 }
  0x31   : > { %p2195_p4 = pnand %p2193_p1, %p2567_p3  ;;  %p2202_p13 = por %p2201_p6, %p2200_p11 }
  0x33   : > { %p2196_p12 = pneg %p2195_p4 }
  0x35   : > { %p2203_p5 = pnand %p2202_p13, %p2196_p12 }
  0x37   : > { %2206 = shalt.err (!%p2203_p5)
}
  0x38   : > { %s2865_s22 = smov 128   ;;  %s2867_s29 = smov 8  }
  0x39   : > { %2099 = dma.hbm_to_vmem [thread:$0]  (!%p2553_p2), %s2880_s1, 2048, %s222_s17, [#allocation6], %s2865_s22, %s2865_s22, %s2867_s29  }
  0x3a   : > { %s2207_s10 = scalar_lea.hbm %s2853_s3, 4096 }
  0x3b   : > { %p2208_p4 = scmp.ne.s32.totalorder %s2853_s3, %s2207_s10  ;;  %p2214_p11 = scmp.lt.u32.totalorder %s2207_s10, %s2853_s3 }
  0x3d   : > { %p2210_p5 = pnand %p2208_p4, %p2567_p3 }
  0x3f   : > { %p2211_p6 = pneg %p2210_p5 }
  0x41   : > { %p2216_p12 = pnand %p2214_p11, %p2211_p6 }
  0x43   : > { %2219 = shalt.err (!%p2216_p12)
}
  0x44   : > { %s2220_s17 = scalar_lea.vmem %s2557_s20, 4096  ;;  %p2228_p8 = scmp.lt.s32.totalorder %s2557_s20, %s2557_s20 }
  0x45   : > { %p2221_p13 = scmp.ne.s32.totalorder %s2557_s20, %s2220_s17  ;;  %p2229_p9 = scmp.lt.s32.totalorder %s2220_s17, %s2220_s17 }
  0x47   : > { %p2223_p0 = pnand %p2221_p13, %p2567_p3  ;;  %p2230_p10 = por %p2229_p9, %p2228_p8 }
  0x49   : > { %p2224_p7 = pneg %p2223_p0 }
  0x4b   : > { %p2231_p1 = pnand %p2230_p10, %p2224_p7 }
  0x4d   : > { %2234 = shalt.err (!%p2231_p1)
}
  0x4e   : > { %s2431_s30 = smov 256   ;;  %s2432_s24 = smov 16  }
  0x4f   : > { %2105 = dma.hbm_to_vmem [thread:$0]  (!%p2553_p2), %s2853_s3, 4096, %s2557_s20, [#allocation9], %s2431_s30, %s2431_s30, %s2432_s24  }
  0x50   : > { %s2433_s23 = smov [#allocation7]   ;;  %s2235_s21 = scalar_lea.hbm %s2852_s2, 8192 }
  0x51   : > { %s234_s8 = sshll.u32 %s2433_s23, 4  ;;  %p2236_p4 = scmp.ne.s32.totalorder %s2852_s2, %s2235_s21  ;;  %s235_s8 = int_to_ptr.vmem [resolvable:$true] %s234_s8 }
  0x52   : > { %p2242_p11 = scmp.lt.u32.totalorder %s2235_s21, %s2852_s2 }
  0x53   : > { %p2238_p5 = pnand %p2236_p4, %p2567_p3 }
  0x55   : > { %p2239_p6 = pneg %p2238_p5 }
  0x57   : > { %p2244_p12 = pnand %p2242_p11, %p2239_p6 }
  0x59   : > { %2247 = shalt.err (!%p2244_p12)
}
  0x5a   : > { %s2248_s20 = scalar_lea.vmem %s235_s8, 8192  ;;  %p2256_p8 = scmp.lt.s32.totalorder %s235_s8, %s235_s8 }
  0x5b   : > { %p2249_p13 = scmp.ne.s32.totalorder %s235_s8, %s2248_s20  ;;  %p2257_p9 = scmp.lt.s32.totalorder %s2248_s20, %s2248_s20 }
  0x5d   : > { %p2251_p0 = pnand %p2249_p13, %p2567_p3  ;;  %p2258_p10 = por %p2257_p9, %p2256_p8 }
  0x5f   : > { %p2252_p7 = pneg %p2251_p0 }
  0x61   : > { %p2259_p1 = pnand %p2258_p10, %p2252_p7 }
  0x63   : > { %2262 = shalt.err (!%p2259_p1)
}
  0x64   : > { %s2434_s22 = smov 512   ;;  %s2435_s30 = smov 32  }
  0x65   : > { %2102 = dma.hbm_to_vmem [thread:$0]  (!%p2553_p2), %s2852_s2, 8192, %s235_s8, [#allocation6], %s2434_s22, %s2434_s22, %s2435_s30  }
  0x66   : > { %s2436_s24 = smov [#allocation10]   ;;  %s2437_s14 = smov [#allocation11]  }
  0x67   : > { %s260_s10 = sshll.u32 %s2436_s24, 4  ;;  %s273_s23 = sshll.u32 %s2437_s14, 4  ;;  %s261_s10 = int_to_ptr.vmem [resolvable:$true] %s260_s10  ;;  %s2627_s23 = int_to_ptr.vmem [resolvable:$true] %s273_s23 }
  0x68   : > { %s2263_s21 = scalar_lea.hbm %s2854_s4, 2048 }
  0x69   : > { %p2264_p4 = scmp.ne.s32.totalorder %s2854_s4, %s2263_s21  ;;  %p2270_p11 = scmp.lt.u32.totalorder %s2263_s21, %s2854_s4 }
  0x6b   : > { %p2266_p5 = pnand %p2264_p4, %p2567_p3 }
  0x6d   : > { %p2267_p6 = pneg %p2266_p5 }
  0x6f   : > { %p2272_p12 = pnand %p2270_p11, %p2267_p6 }
  0x71   : > { %2275 = shalt.err (!%p2272_p12)
}
  0x72   : > { %s2276_s22 = scalar_lea.vmem %s261_s10, 2048  ;;  %p2284_p8 = scmp.lt.s32.totalorder %s261_s10, %s261_s10 }
  0x73   : > { %p2277_p13 = scmp.ne.s32.totalorder %s261_s10, %s2276_s22  ;;  %p2285_p9 = scmp.lt.s32.totalorder %s2276_s22, %s2276_s22 }
  0x75   : > { %p2279_p0 = pnand %p2277_p13, %p2567_p3  ;;  %p2286_p10 = por %p2285_p9, %p2284_p8 }
  0x77   : > { %p2280_p7 = pneg %p2279_p0 }
  0x79   : > { %p2287_p1 = pnand %p2286_p10, %p2280_p7 }
  0x7b   : > { %2290 = shalt.err (!%p2287_p1)
}
  0x7c   : > { %s2882_s30 = smov 8   ;;  %s2883_s29 = smov 128  }
  0x7d   : > { %2108 = dma.hbm_to_vmem [thread:$0]  (!%p2553_p2), %s2854_s4, 2048, %s261_s10, [#allocation9], %s2883_s29, %s2883_s29, %s2882_s30  }
  0x7e   : > { %s2291_s21 = scalar_lea.hbm %s2855_s5, 2048 }
  0x7f   : > { %p2292_p4 = scmp.ne.s32.totalorder %s2855_s5, %s2291_s21  ;;  %p2298_p11 = scmp.lt.u32.totalorder %s2291_s21, %s2855_s5 }
  0x81   : > { %p2294_p5 = pnand %p2292_p4, %p2567_p3 }
  0x83   : > { %p2295_p6 = pneg %p2294_p5 }
  0x85   : > { %p2300_p12 = pnand %p2298_p11, %p2295_p6 }
  0x87   : > { %2303 = shalt.err (!%p2300_p12)
}
  0x88   : > { %s2304_s10 = scalar_lea.vmem %s2627_s23, 2048  ;;  %p2312_p8 = scmp.lt.s32.totalorder %s2627_s23, %s2627_s23 }
  0x89   : > { %p2305_p13 = scmp.ne.s32.totalorder %s2627_s23, %s2304_s10  ;;  %p2313_p9 = scmp.lt.s32.totalorder %s2304_s10, %s2304_s10 }
  0x8b   : > { %p2307_p0 = pnand %p2305_p13, %p2567_p3  ;;  %p2314_p10 = por %p2313_p9, %p2312_p8 }
  0x8d   : > { %p2308_p7 = pneg %p2307_p0 }
  0x8f   : > { %p2315_p1 = pnand %p2314_p10, %p2308_p7 }
  0x91   : > { %2318 = shalt.err (!%p2315_p1)
}
  0x92   : > { %2111 = dma.hbm_to_vmem [thread:$0]  (!%p2553_p2), %s2855_s5, 2048, %s2627_s23, [#allocation12], %s2883_s29, %s2883_s29, %s2882_s30  }
  0x93   : > { %p1405_p3 = scmp.ge.s32.totalorder %s2425_s27, 2 }
  0x94   : > { %p2884_p4 = scmp.ne.s32.totalorder (!%p1405_p3), %s2873_s11, 0 }
  0x95   : > { %286 = sbr.rel (%p1405_p3) target bundleno = 191 (0xbf), region = 40 }
  0x9c   : > { %289 = sbr.rel (!%p2884_p4) target bundleno = 191 (0xbf), region = 44  ;;  %s290_s9 = sand.u32 (%p2884_p4), 1, %s2421_s26  }
  0x9d   : > { %s1407_s18 = sshll.u32 (%p2884_p4), %s2425_s27, 1  ;;  %s1406_s14 = sshll.u32 (%p2884_p4), %s290_s9, 5 }
  0x9e   : > { %s296_s16 = ssub.s32 (%p2884_p4), 3, %s1407_s18  ;;  %s2686_s30 = scalar_lea.sflag (%p2884_p4), [#allocation3], %s290_s9 }
  0x9f   : > { %p297_p5 = scmp.lt.s32.totalorder (%p2884_p4), %s296_s16, 2  ;;  %s294_s29 = scalar_lea.vmem (%p2884_p4), [#allocation2], %s1406_s14 }
  0xa3   : > { %s2903_s16 = smov (!%p297_p5, %s296_s16), 2 }
  0xa4   : > { %s2683_s19 = sshll.u32 %s2903_s16, 8 }
  0xa5   : > { %s302_s23 = ssub.s32 512, %s2683_s19 }
  0xa6   : > { %303 = vsyncadd %s2686_s30, %s302_s23  ;;  %p1410_p2 = scmp.ne.s32.totalorder %s2683_s19, 0  ;;  %s1443_s11 = sshll.u32 %s2425_s27, 9 }
  0xa7   : > { %s2694_s20 = scalar_lea.hbm %s2850_s0, %s1443_s11  ;;  %s309_s1 = sshll.u32 %s294_s29, 4  ;;  %s2696_s1 = int_to_ptr.vmem [resolvable:$true] %s309_s1 }
  0xa8   : > { %s2319_s8 = scalar_lea.hbm %s2694_s20, %s2683_s19  ;;  %s2323_s24 = scalar_lea.hbm %s2850_s0, 768 }
  0xa9   : > { %p2320_p6 = scmp.ne.s32.totalorder %s2694_s20, %s2319_s8  ;;  %p2324_p13 = scmp.lt.u32.totalorder %s2694_s20, %s2850_s0 }
  0xaa   : > { %p2325_p0 = scmp.lt.u32.totalorder %s2323_s24, %s2319_s8  ;;  %p2327_p8 = scmp.lt.u32.totalorder %s2319_s8, %s2694_s20 }
  0xab   : > { %p2321_p11 = pnand %p2320_p6, %p1410_p2 }
  0xac   : > { %p2326_p7 = por %p2325_p0, %p2324_p13 }
  0xad   : > { %p2322_p12 = pneg %p2321_p11 }
  0xae   : > { %p2328_p9 = por %p2327_p8, %p2326_p7 }
  0xb0   : > { %p2329_p10 = pnand %p2328_p9, %p2322_p12 }
  0xb2   : > { %2332 = shalt.err (!%p2329_p10)
}
  0xb3   : > { %s2333_s14 = scalar_lea.vmem %s2696_s1, %s2683_s19  ;;  %s2438_s16 = smov [#allocation2]  }
  0xb4   : > { %p2334_p1 = scmp.ne.s32.totalorder %s2696_s1, %s2333_s14  ;;  %s2337_s23 = sshll.u32 %s2438_s16, 4  ;;  %s2338_s23 = int_to_ptr.vmem [resolvable:$false] %s2337_s23 }
  0xb5   : > { %s2339_s29 = scalar_lea.vmem %s2338_s23, 1024  ;;  %p2340_p6 = scmp.lt.s32.totalorder %s2696_s1, %s2338_s23 }
  0xb6   : > { %p2335_p4 = pnand %p2334_p1, %p1410_p2  ;;  %p2341_p11 = scmp.lt.s32.totalorder %s2339_s29, %s2333_s14 }
  0xb8   : > { %p2336_p5 = pneg %p2335_p4  ;;  %p2342_p13 = por %p2341_p11, %p2340_p6 }
  0xba   : > { %p2343_p0 = pnand %p2342_p13, %p2336_p5 }
  0xbc   : > { %2346 = shalt.err (!%p2343_p0)
}
  0xbd   : > { %s2439_s11 = smov 256   ;;  %s2440_s21 = smov 16  }
  0xbe   : > { %315 = dma.hbm_to_vmem [thread:$0]  (%p1410_p2), %s2694_s20, %s2683_s19, %s2696_s1, %s2686_s30, %s2439_s11, %s2439_s11, %s2440_s21  }
  0xbf PF: > { %p2885_p12 = scmp.ne.s32.totalorder %s2878_s15, 0 }
  0xc0   : > { %s2726_s17 = sand.u32 (!%p2885_p12), 1, %s2417_s25   ;;  %p2886_p7 = scmp.ne.s32.totalorder (!%p2885_p12), %s2874_s12, 0 }
  0xc1   : > { %321 = sbr.rel (%p2885_p12) target bundleno = 2040 (0x7f8), region = 48  ;;  %s1416_s8 = sshll.u32 (!%p2885_p12), %s2726_s17, 5 }
  0xc2   : > { %s324_s10 = scalar_lea.sflag (!%p2885_p12), [#allocation3], %s2726_s17  ;;  %s2730_s22 = scalar_lea.vmem (!%p2885_p12), [#allocation2], %s1416_s8 }
  0xc8   : > { %2392 = dma.done.wait (%p2886_p7), %s324_s10, 512  }
  0xc9   : > { %2394 = vsyncadd (%p2886_p7), %s324_s10, 4294966784  ;;  %p2887_p2 = scmp.eq.s32.totalorder %s2506_s28, 0 }
  0xcb   : > { %2396 = dma.done.wait (%p2887_p2), [#allocation6], 10240   ;;  %p2888_p8 = pmov %p2887_p2 }
  0xcc   : > { %p2889_p9 = pmov %p2887_p2 }
  0xcd   : > { %2398 = vsyncadd (%p2888_p8), [#allocation6], 4294957056 }
  0xce   : > { %2400 = dma.done.wait (%p2889_p9), [#allocation9], 6144   ;;  %p2890_p10 = pmov %p2887_p2 }
  0xcf   : > { %p2891_p1 = pmov %p2887_p2 }
  0xd0   : > { %2402 = vsyncadd (%p2890_p10), [#allocation9], 4294961152 }
  0xd1   : > { %2404 = dma.done.wait (%p2891_p1), [#allocation12], 2048   ;;  %p2892_p4 = pmov %p2891_p1 }
  0xd2   : > { %v402_v0 = vld [vmem:[#allocation5] sm:$0xff]  ;;  %v403_v1 = vld [vmem:[#allocation5 + $0x8] sm:$0xff]  ;;  %v404_v2 = vld [vmem:[#allocation5 + $0x10] sm:$0xff]  ;;  %s1422_s18 = sshll.u32 %s2726_s17, 6  ;;  %s1256_s12 = scalar_lea.sflag [#allocation4], %s2726_s17 }
  0xd3   : > { %2406 = vsyncadd (%p2892_p4), [#allocation12], 4294965248  ;;  %v1818_v3 = vpack.c.bf16 %v403_v1, %v402_v0  ;;  %v405_v4 = vld [vmem:[#allocation5 + $0x18] sm:$0xff]  ;;  %v406_v6 = vld [vmem:[#allocation5 + $0x20] sm:$0xff]  ;;  %s2763_s14 = scalar_lea.vmem [#allocation13], %s1422_s18  ;;  %p2893_p5 = scmp.ne.s32.totalorder %s2875_s13, 0 }
  0xd4   : > { %v1822_v5 = vpack.c.bf16 %v405_v4, %v404_v2  ;;  %v407_v7 = vld [vmem:[#allocation5 + $0x28] sm:$0xff]  ;;  %v408_v9 = vld [vmem:[#allocation5 + $0x30] sm:$0xff]  ;;  %v409_v10 = vld [vmem:[#allocation5 + $0x38] sm:$0xff]  ;;  %s1431_s15 = sshll.u32 (%p2893_p5), %s2506_s28, 1 }
  0xd5   : > { %1819 = vmatprep.subr.bf16.mxu0 %v1818_v3  ;;  %v1826_v8 = vpack.c.bf16 %v407_v7, %v406_v6  ;;  %v398_v11 = vld [vmem:[%s2730_s22] sm:$0xff]  ;;  %v1830_v20 = vpack.c.bf16 %v409_v10, %v408_v9  ;;  %v411_v22 = vld [vmem:[#allocation5 + $0x48] sm:$0xff]  ;;  %v412_v27 = vld [vmem:[#allocation5 + $0x50] sm:$0xff]  ;;  %s1264_s19 = ssub.s32 (%p2893_p5), 3, %s1431_s15 }
  0xd6   : > { %1821 = vmatpush3.bf16.msra.mxu0 %v1818_v3  ;;  %1605 = vmatprep.mubr.f32.mxu0 %v398_v11  ;;  %v505_v12 = vld [vmem:[#allocation7] sm:$0xff]  ;;  %v413_v28 = vld [vmem:[#allocation5 + $0x58] sm:$0xff]  ;;  %v415_v34 = vld [vmem:[#allocation5 + $0x68] sm:$0xff]  ;;  %p1265_p6 = scmp.lt.s32.totalorder (%p2893_p5), %s1264_s19, 2 }
  0xd7   : > { %1823 = vmatprep.subr.bf16.mxu0 %v1822_v5  ;;  %v506_v13 = vld [vmem:[#allocation7 + $0x20] sm:$0xff]  ;;  %v1838_v32 = vpack.c.bf16 %v413_v28, %v412_v27  ;;  %v416_v39 = vld [vmem:[#allocation5 + $0x70] sm:$0xff]  ;;  %v417_v40 = vld [vmem:[#allocation5 + $0x78] sm:$0xff] }
  0xd8   : > { %v507_v14 = vld [vmem:[#allocation7 + $0x40] sm:$0xff]  ;;  %v1850_v15 = vpack.c.bf16 %v506_v13, %v505_v12  ;;  %v1846_v42 = vpack.c.bf16 %v417_v40, %v416_v39  ;;  %v399_v43 = vld [vmem:[%s2730_s22 + $0x10] sm:$0xff]  ;;  %v608_v50 = vld [vmem:[#allocation7 + $0x8] sm:$0xff] }
  0xd9   : > { %v508_v16 = vld [vmem:[#allocation7 + $0x60] sm:$0xff]  ;;  %v609_v51 = vld [vmem:[#allocation7 + $0x28] sm:$0xff] }
  0xda   : > { %1825 = vmatpush3.bf16.msra.mxu0 %v1822_v5  ;;  %v1854_v17 = vpack.c.bf16 %v508_v16, %v507_v14  ;;  %v509_v18 = vld [vmem:[#allocation7 + $0x80] sm:$0xff]  ;;  %1851 = vmatprep.subr.bf16.mxu1 %v1850_v15  ;;  %v610_v52 = vld [vmem:[#allocation7 + $0x48] sm:$0xff]  ;;  %v1882_v53 = vpack.c.bf16 %v609_v51, %v608_v50 }
  0xdb   : > { %v510_v19 = vld [vmem:[#allocation7 + $0xa0] sm:$0xff]  ;;  %1827 = vmatprep.subr.bf16.mxu0 %v1826_v8  ;;  %1853 = vmatpush3.bf16.msra.mxu1 %v1850_v15  ;;  %v611_v54 = vld [vmem:[#allocation7 + $0x68] sm:$0xff] }
  0xdc   : > { %v410_v21 = vld [vmem:[#allocation5 + $0x40] sm:$0xff]  ;;  %1855 = vmatprep.subr.bf16.mxu1 %v1854_v17  ;;  %v1858_v23 = vpack.c.bf16 %v510_v19, %v509_v18  ;;  %v1886_v55 = vpack.c.bf16 %v611_v54, %v610_v52  ;;  %v612_v56 = vld [vmem:[#allocation7 + $0x88] sm:$0xff] }
  0xdd   : > { %v511_v24 = vld [vmem:[#allocation7 + $0xc0] sm:$0xff]  ;;  %v1834_v26 = vpack.c.bf16 %v411_v22, %v410_v21  ;;  %v613_v57 = vld [vmem:[#allocation7 + $0xa8] sm:$0xff] }
  0xde   : > { %1829 = vmatpush3.bf16.msra.mxu0 %v1826_v8  ;;  %v512_v25 = vld [vmem:[#allocation7 + $0xe0] sm:$0xff]  ;;  %v1890_v58 = vpack.c.bf16 %v613_v57, %v612_v56  ;;  %v614_v59 = vld [vmem:[#allocation7 + $0xc8] sm:$0xff] }
  0xdf   : > { %1831 = vmatprep.subr.bf16.mxu0 %v1830_v20  ;;  %1857 = vmatpush3.bf16.msra.mxu1 %v1854_v17  ;;  %v1862_v29 = vpack.c.bf16 %v512_v25, %v511_v24  ;;  %v513_v30 = vld [vmem:[#allocation7 + $0x100] sm:$0xff]  ;;  %v615_v60 = vld [vmem:[#allocation7 + $0xe8] sm:$0xff]  ;;  %v718_v25 = vld [vmem:[#allocation8 + $0x38] sm:$0xff] }
  0xe0   : > { %1859 = vmatprep.subr.bf16.mxu1 %v1858_v23  ;;  %v514_v31 = vld [vmem:[#allocation7 + $0x120] sm:$0xff]  ;;  %v1894_v61 = vpack.c.bf16 %v615_v60, %v614_v59  ;;  %v616_v62 = vld [vmem:[#allocation7 + $0x108] sm:$0xff] }
  0xe1   : > { %v414_v33 = vld [vmem:[#allocation5 + $0x60] sm:$0xff]  ;;  %v1866_v35 = vpack.c.bf16 %v514_v31, %v513_v30  ;;  %v617_v63 = vld [vmem:[#allocation7 + $0x128] sm:$0xff]  ;;  %v722_v31 = vld [vmem:[#allocation8 + $0x58] sm:$0xff] }
  0xe2   : > { %1833 = vmatpush3.bf16.msra.mxu0 %v1830_v20  ;;  %v515_v36 = vld [vmem:[#allocation7 + $0x140] sm:$0xff]  ;;  %v1842_v38 = vpack.c.bf16 %v415_v34, %v414_v33  ;;  %v1898_v0 = vpack.c.bf16 %v617_v63, %v616_v62  ;;  %v618_v1 = vld [vmem:[#allocation7 + $0x148] sm:$0xff]  ;;  %v714_v20 = vld [vmem:[#allocation8 + $0x18] sm:$0xff] }
  0xe3   : > { %1835 = vmatprep.subr.bf16.mxu0 %v1834_v26  ;;  %1861 = vmatpush3.bf16.msra.mxu1 %v1858_v23  ;;  %v516_v37 = vld [vmem:[#allocation7 + $0x160] sm:$0xff]  ;;  %v619_v2 = vld [vmem:[#allocation7 + $0x168] sm:$0xff]  ;;  %v713_v23 = vld [vmem:[#allocation8 + $0x10] sm:$0xff] }
  0xe4   : > { %1863 = vmatprep.subr.bf16.mxu1 %v1862_v29  ;;  %v1870_v41 = vpack.c.bf16 %v516_v37, %v515_v36  ;;  %v517_v44 = vld [vmem:[#allocation7 + $0x180] sm:$0xff]  ;;  %v1902_v3 = vpack.c.bf16 %v619_v2, %v618_v1  ;;  %v620_v13 = vld [vmem:[#allocation7 + $0x188] sm:$0xff]  ;;  %v726_v37 = vld [vmem:[#allocation8 + $0x78] sm:$0xff] }
  0xe5   : > { %v518_v45 = vld [vmem:[#allocation7 + $0x1a0] sm:$0xff]  ;;  %v621_v14 = vld [vmem:[#allocation7 + $0x1a8] sm:$0xff] }
  0xe6   : > { %1837 = vmatpush3.bf16.msra.mxu0 %v1834_v26  ;;  %v1874_v46 = vpack.c.bf16 %v518_v45, %v517_v44  ;;  %v519_v47 = vld [vmem:[#allocation7 + $0x1c0] sm:$0xff]  ;;  %v1906_v15 = vpack.c.bf16 %v621_v14, %v620_v13  ;;  %v622_v16 = vld [vmem:[#allocation7 + $0x1c8] sm:$0xff] }
  0xe7   : > { %1839 = vmatprep.subr.bf16.mxu0 %v1838_v32  ;;  %1865 = vmatpush3.bf16.msra.mxu1 %v1862_v29  ;;  %v520_v48 = vld [vmem:[#allocation7 + $0x1e0] sm:$0xff]  ;;  %v623_v17 = vld [vmem:[#allocation7 + $0x1e8] sm:$0xff]  ;;  %v717_v29 = vld [vmem:[#allocation8 + $0x30] sm:$0xff] }
  0xe8   : > { %1867 = vmatprep.subr.bf16.mxu1 %v1866_v35  ;;  %v1878_v49 = vpack.c.bf16 %v520_v48, %v519_v47  ;;  %v1423_v4 = vld [vmem:[%s2856_s6] ss:$0 sm:$0xff]  ;;  %v1910_v18 = vpack.c.bf16 %v623_v17, %v622_v16  ;;  %v712_v19 = vld [vmem:[#allocation8 + $0x8] sm:$0xff]  ;;  %v729_v47 = vld [vmem:[#allocation8 + $0x90] sm:$0xff] }
  0xe9   : > { %v711_v21 = vld [vmem:[#allocation8] sm:$0xff]  ;;  %v1914_v22 = vpack.c.bf16 %v714_v20, %v712_v19  ;;  %v716_v24 = vld [vmem:[#allocation8 + $0x28] sm:$0xff]  ;;  %v844_v17 = vld [vmem:[#allocation10 + $0x18] sm:$0xff] }
  0xea   : > { %1841 = vmatpush3.bf16.msra.mxu0 %v1838_v32  ;;  %v1916_v26 = vpack.c.bf16 %v713_v23, %v711_v21  ;;  %v1918_v27 = vpack.c.bf16 %v718_v25, %v716_v24  ;;  %v715_v28 = vld [vmem:[#allocation8 + $0x20] sm:$0xff]  ;;  %v720_v30 = vld [vmem:[#allocation8 + $0x48] sm:$0xff] }
  0xeb   : > { %1843 = vmatprep.subr.bf16.mxu0 %v1842_v38  ;;  %1869 = vmatpush3.bf16.msra.mxu1 %v1866_v35  ;;  %v1920_v32 = vpack.c.bf16 %v717_v29, %v715_v28  ;;  %v1922_v33 = vpack.c.bf16 %v722_v31, %v720_v30  ;;  %v719_v34 = vld [vmem:[#allocation8 + $0x40] sm:$0xff]  ;;  %v721_v35 = vld [vmem:[#allocation8 + $0x50] sm:$0xff]  ;;  %v724_v36 = vld [vmem:[#allocation8 + $0x68] sm:$0xff] }
  0xec   : > { %1871 = vmatprep.subr.bf16.mxu1 %v1870_v41  ;;  %v1926_v39 = vpack.c.bf16 %v726_v37, %v724_v36  ;;  %v723_v40 = vld [vmem:[#allocation8 + $0x60] sm:$0xff]  ;;  %v732_v48 = vld [vmem:[#allocation8 + $0xa8] sm:$0xff]  ;;  %v847_v31 = vld [vmem:[#allocation10 + $0x30] sm:$0xff] }
  0xed   : > { %v731_v52 = vld [vmem:[#allocation8 + $0xa0] sm:$0xff]  ;;  %v736_v54 = vld [vmem:[#allocation8 + $0xc8] sm:$0xff]  ;;  %v851_v37 = vld [vmem:[#allocation10 + $0x50] sm:$0xff] }
  0xee   : > { %1845 = vmatpush3.bf16.msra.mxu0 %v1842_v38  ;;  %v1924_v38 = vpack.c.bf16 %v721_v35, %v719_v34  ;;  %v841_v13 = vld [vmem:[#allocation10] sm:$0xff]  ;;  %v842_v14 = vld [vmem:[#allocation10 + $0x8] sm:$0xff] }
  0xef   : > { %1847 = vmatprep.subr.bf16.mxu0 %v1846_v42  ;;  %1873 = vmatpush3.bf16.msra.mxu1 %v1870_v41  ;;  %v725_v41 = vld [vmem:[#allocation8 + $0x70] sm:$0xff]  ;;  %v1946_v16 = vpack.c.bf16 %v842_v14, %v841_v13  ;;  %v1425_v19 = vld [vmem:[%s2856_s6 + $0x2] ss:$0 sm:$0xff]  ;;  %v846_v29 = vld [vmem:[#allocation10 + $0x28] sm:$0xff] }
  0xf0   : > { %1875 = vmatprep.subr.bf16.mxu1 %v1874_v46  ;;  %v1928_v44 = vpack.c.bf16 %v725_v41, %v723_v40  ;;  %v845_v28 = vld [vmem:[#allocation10 + $0x20] sm:$0xff]  ;;  %v850_v35 = vld [vmem:[#allocation10 + $0x48] sm:$0xff] }
  0xf1   : > { %v1954_v30 = vpack.c.bf16 %v846_v29, %v845_v28  ;;  %v849_v34 = vld [vmem:[#allocation10 + $0x40] sm:$0xff]  ;;  %v854_v41 = vld [vmem:[#allocation10 + $0x68] sm:$0xff]  ;;  %v957_v28 = vld [vmem:[#allocation7 + $0x1b0] sm:$0xff] }
  0xf2   : > { %1849 = vmatpush3.bf16.msra.mxu0 %v1846_v42  ;;  %v728_v42 = vld [vmem:[#allocation8 + $0x88] sm:$0xff]  ;;  %v1962_v36 = vpack.c.bf16 %v850_v35, %v849_v34  ;;  %v1048_v34 = vld [vmem:[#allocation7 + $0x38] sm:$0xff] }
  0xf3   : > { %1877 = vmatpush3.bf16.msra.mxu1 %v1874_v46  ;;  %1883 = vmatprep.subr.bf16.mxu0 %v1882_v53  ;;  %v727_v46 = vld [vmem:[#allocation8 + $0x80] sm:$0xff]  ;;  %v1049_v35 = vld [vmem:[#allocation7 + $0x58] sm:$0xff] }
  0xf4   : > { %1879 = vmatprep.subr.bf16.mxu1 %v1878_v49  ;;  %v1932_v50 = vpack.c.bf16 %v729_v47, %v727_v46  ;;  %v944_v46 = vld [vmem:[#allocation7 + $0x10] sm:$0xff] }
  0xf5   : > { %1606 = vmatmul.mubr.f32.vlgmr.msra.gmra.mrb[0].mxu0 %v399_v43  ;;  %v730_v43 = vld [vmem:[#allocation8 + $0x98] sm:$0xff]  ;;  %v945_v47 = vld [vmem:[#allocation7 + $0x30] sm:$0xff] }
  0xf6   : > { %1885 = vmatpush3.bf16.msra.mxu0 %v1882_v53  ;;  %v1930_v45 = vpack.c.bf16 %v730_v43, %v728_v42  ;;  %v733_v53 = vld [vmem:[#allocation8 + $0xb0] sm:$0xff] }
  0xf7   : > { %1881 = vmatpush3.bf16.msra.mxu1 %v1878_v49  ;;  %1887 = vmatprep.subr.bf16.mxu0 %v1886_v55  ;;  %v734_v49 = vld [vmem:[#allocation8 + $0xb8] sm:$0xff]  ;;  %v1936_v56 = vpack.c.bf16 %v733_v53, %v731_v52  ;;  %v855_v43 = vld [vmem:[#allocation10 + $0x70] sm:$0xff] }
  0xf8   : > { %1915 = vmatprep.subr.bf16.mxu1 %v1914_v22  ;;  %v1934_v51 = vpack.c.bf16 %v734_v49, %v732_v48  ;;  %v946_v48 = vld [vmem:[#allocation7 + $0x50] sm:$0xff]  ;;  %v1978_v49 = vpack.c.bf16 %v945_v47, %v944_v46  ;;  %v1056_v46 = vld [vmem:[#allocation7 + $0x138] sm:$0xff] }
  0xf9   : > { %v948_v52 = vld [vmem:[#allocation7 + $0x90] sm:$0xff] }
  0xfa   : > { %1889 = vmatpush3.bf16.msra.mxu0 %v1886_v55  ;;  %v738_v55 = vld [vmem:[#allocation8 + $0xd8] sm:$0xff]  ;;  %v949_v53 = vld [vmem:[#allocation7 + $0xb0] sm:$0xff] }
  0xfb   : > { %1891 = vmatprep.subr.bf16.mxu0 %v1890_v58  ;;  %v1938_v57 = vpack.c.bf16 %v738_v55, %v736_v54  ;;  %v1986_v54 = vpack.c.bf16 %v949_v53, %v948_v52  ;;  %v950_v55 = vld [vmem:[#allocation7 + $0xd0] sm:$0xff] }
  0xfe   : > { %1893 = vmatpush3.bf16.msra.mxu0 %v1890_v58  ;;  %v1424_v58 = vld [vmem:[%s2856_s6 + $0x1] ss:$0 sm:$0xff] }
  0xff   : > { %1895 = vmatprep.subr.bf16.mxu0 %v1894_v61 }
 0x102   : > { %1897 = vmatpush3.bf16.msra.mxu0 %v1894_v61 }
 0x103   : > { %1899 = vmatprep.subr.bf16.mxu0 %v1898_v0 }
 0x106   : > { %1901 = vmatpush3.bf16.msra.mxu0 %v1898_v0 }
 0x107   : > { %1903 = vmatprep.subr.bf16.mxu0 %v1902_v3 }
 0x10a   : > { %1905 = vmatpush3.bf16.msra.mxu0 %v1902_v3  ;;  %v735_v3 = vld [vmem:[#allocation8 + $0xc0] sm:$0xff] }
 0x10b   : > { %1907 = vmatprep.subr.bf16.mxu0 %v1906_v15 }
 0x10e   : > { %1909 = vmatpush3.bf16.msra.mxu0 %v1906_v15  ;;  %v843_v15 = vld [vmem:[#allocation10 + $0x10] sm:$0xff] }
 0x10f   : > { %1911 = vmatprep.subr.bf16.mxu0 %v1910_v18 }
 0x112   : > { %1913 = vmatpush3.bf16.msra.mxu0 %v1910_v18  ;;  %v1950_v18 = vpack.c.bf16 %v844_v17, %v843_v15 }
 0x113   : > { %1947 = vmatprep.subr.bf16.mxu0 %v1946_v16 }
 0x1c8   : > { %v1607_v5 = vpop.f32.mrb[0].mxu0 }
 0x1c9   : > { %v496_v6 = vadd.f32 %v1607_v5, %v1423_v4  ;;  %v490_v7 = vpop.f32.mrb[1].mxu0 }
 0x1ca   : > { %v491_v8 = vadd.f32 %v1423_v4, %v490_v7  ;;  %v737_v4 = vld [vmem:[#allocation8 + $0xd0] sm:$0xff]  ;;  %v742_v7 = vld [vmem:[#allocation8 + $0xf8] sm:$0xff] }
 0x1cb   : > { %v502_v9 = vmul.f32 0.2, %v496_v6  ;;  %vm500_vm1 = vcmp.gt.f32.partialorder %v496_v6, 0.0  ;;  %v1940_v5 = vpack.c.bf16 %v737_v4, %v735_v3  ;;  %v393_v3 = vld [vmem:[%s2856_s6 + $0x3] sm:$0x3] }
 0x1cc   : > { %vm499_vm0 = vcmp.gt.f32.partialorder %v491_v8, 0.0  ;;  %v501_v10 = vmul.f32 0.2, %v491_v8 }
 0x1cd   : > { %v504_v12 = vsel %vm500_vm1, %v496_v6, %v502_v9  ;;  %v740_v6 = vld [vmem:[#allocation8 + $0xe8] sm:$0xff]  ;;  %v739_v9 = vld [vmem:[#allocation8 + $0xe0] sm:$0xff] }
 0x1ce   : > { %v503_v11 = vsel %vm499_vm0, %v491_v8, %v501_v10  ;;  %v1942_v8 = vpack.c.bf16 %v742_v7, %v740_v6  ;;  %v741_v10 = vld [vmem:[#allocation8 + $0xf0] sm:$0xff] }
 0x1cf   : > { %1640 = vmatprep.mubr.f32.mxu1 %v503_v11  ;;  %v1944_v11 = vpack.c.bf16 %v741_v10, %v739_v9 }
 0x1d0   : > { %1641 = vmatmul.mubr.f32.vlgmr.msra.gmra.mrb[0].mxu1 %v504_v12  ;;  %v2441_v12 = vmov 0.0  }
 0x1d1   : > { %1917 = vmatpush1.bf16.msra.mxu1 %v1916_v26  ;;  %818 = vmatprep.mubr.f32.mxu1 %v2441_v12 }
 0x1d2   : > { %1919 = vmatprep.subr.bf16.mxu1 %v1918_v27 }
 0x1d5   : > { %1921 = vmatpush1.bf16.msra.mxu1 %v1920_v32  ;;  %v848_v32 = vld [vmem:[#allocation10 + $0x38] sm:$0xff] }
 0x1d6   : > { %1923 = vmatprep.subr.bf16.mxu1 %v1922_v33  ;;  %v1958_v33 = vpack.c.bf16 %v848_v32, %v847_v31  ;;  %v959_v31 = vld [vmem:[#allocation7 + $0x1f0] sm:$0xff] }
 0x1d9   : > { %1925 = vmatpush1.bf16.msra.mxu1 %v1924_v38  ;;  %v852_v38 = vld [vmem:[#allocation10 + $0x58] sm:$0xff] }
 0x1da   : > { %1927 = vmatprep.subr.bf16.mxu1 %v1926_v39  ;;  %v853_v39 = vld [vmem:[#allocation10 + $0x60] sm:$0xff]  ;;  %v1966_v40 = vpack.c.bf16 %v852_v38, %v851_v37  ;;  %v1050_v37 = vld [vmem:[#allocation7 + $0x78] sm:$0xff] }
 0x1db   : > { %v1970_v42 = vpack.c.bf16 %v854_v41, %v853_v39  ;;  %v2014_v38 = vpack.c.bf16 %v1050_v37, %v1049_v35  ;;  %v1051_v39 = vld [vmem:[#allocation7 + $0x98] sm:$0xff]  ;;  %v1428_v35 = vld [vmem:[%s2856_s6 + $0x7] ss:$0 sm:$0xff] }
 0x1dd   : > { %1929 = vmatpush1.bf16.msra.mxu1 %v1928_v44  ;;  %v856_v44 = vld [vmem:[#allocation10 + $0x78] sm:$0xff] }
 0x1de   : > { %1931 = vmatprep.subr.bf16.mxu1 %v1930_v45  ;;  %v1974_v45 = vpack.c.bf16 %v856_v44, %v855_v43  ;;  %v1054_v43 = vld [vmem:[#allocation7 + $0xf8] sm:$0xff] }
 0x1e1   : > { %1933 = vmatpush1.bf16.msra.mxu1 %v1932_v50  ;;  %v947_v50 = vld [vmem:[#allocation7 + $0x70] sm:$0xff] }
 0x1e2   : > { %1935 = vmatprep.subr.bf16.mxu1 %v1934_v51  ;;  %v1982_v51 = vpack.c.bf16 %v947_v50, %v946_v48  ;;  %v1057_v48 = vld [vmem:[#allocation7 + $0x158] sm:$0xff] }
 0x1e5   : > { %1937 = vmatpush1.bf16.msra.mxu1 %v1936_v56  ;;  %v951_v56 = vld [vmem:[#allocation7 + $0xf0] sm:$0xff] }
 0x1e6   : > { %1939 = vmatprep.subr.bf16.mxu1 %v1938_v57  ;;  %v1990_v57 = vpack.c.bf16 %v951_v56, %v950_v55 }
 0x1e9   : > { %1941 = vmatpush1.bf16.msra.mxu1 %v1940_v5 }
 0x1ea   : > { %1943 = vmatprep.subr.bf16.mxu1 %v1942_v8 }
 0x1ed   : > { %1945 = vmatpush1.bf16.msra.mxu1 %v1944_v11 }
 0x1ee   : > { %1979 = vmatprep.subr.bf16.mxu1 %v1978_v49 }
 0x2a3   : > { %v1642_v59 = vpop.f32.mrb[0].mxu1 }
 0x2a4   : > { %v599_v60 = vadd.f32 %v1642_v59, %v1424_v58  ;;  %v593_v61 = vpop.f32.mrb[1].mxu1  ;;  %v953_v59 = vld [vmem:[#allocation7 + $0x130] sm:$0xff] }
 0x2a5   : > { %v594_v62 = vadd.f32 %v1424_v58, %v593_v61  ;;  %v952_v58 = vld [vmem:[#allocation7 + $0x110] sm:$0xff] }
 0x2a6   : > { %v605_v63 = vmul.f32 0.2, %v599_v60  ;;  %vm603_vm2 = vcmp.gt.f32.partialorder %v599_v60, 0.0  ;;  %v954_v61 = vld [vmem:[#allocation7 + $0x150] sm:$0xff] }
 0x2a7   : > { %v604_v0 = vmul.f32 0.2, %v594_v62  ;;  %vm602_vm3 = vcmp.gt.f32.partialorder %v594_v62, 0.0 }
 0x2a8   : > { %v607_v2 = vsel %vm603_vm2, %v599_v60, %v605_v63  ;;  %v1994_v60 = vpack.c.bf16 %v953_v59, %v952_v58 }
 0x2a9   : > { %v606_v1 = vsel %vm602_vm3, %v594_v62, %v604_v0  ;;  %v955_v62 = vld [vmem:[#allocation7 + $0x170] sm:$0xff]  ;;  %v744_v0 = vlaneseq }
 0x2aa   : > { %1675 = vmatprep.mubr.f32.mxu0 %v606_v1  ;;  %v1998_v63 = vpack.c.bf16 %v955_v62, %v954_v61  ;;  %v1060_v61 = vld [vmem:[#allocation7 + $0x1b8] sm:$0xff] }
 0x2ab   : > { %1676 = vmatmul.mubr.f32.vlgmr.msra.gmra.mrb[2].mxu0 %v607_v2  ;;  %v745_v1 = vshrl.u32 %v744_v0, 7  ;;  %v1062_v0 = vld [vmem:[#allocation7 + $0x1f8] sm:$0xff] }
 0x2ac   : > { %1949 = vmatpush3.bf16.msra.mxu0 %v1946_v16 }
 0x2ad   : > { %1951 = vmatprep.subr.bf16.mxu0 %v1950_v18  ;;  %v746_v2 = vsub.s32 0, %v745_v1  ;;  %v750_v4 = vsub.s32 1, %v745_v1 }
 0x2af   : > { %v747_v5 = vrot.slane %v393_v3, %v746_v2  ;;  %v751_v6 = vrot.slane %v393_v3, %v750_v4  ;;  %v1150_v2 = vld [vmem:[#allocation11] sm:$0xff]  ;;  %v1151_v3 = vld [vmem:[#allocation11 + $0x8] sm:$0xff]  ;;  %v1152_v4 = vld [vmem:[#allocation11 + $0x10] sm:$0xff] }
 0x2b0   : > { %1953 = vmatpush3.bf16.msra.mxu0 %v1950_v18 }
 0x2b1   : > { %1955 = vmatprep.subr.bf16.mxu0 %v1954_v30 }
 0x2b4   : > { %1957 = vmatpush3.bf16.msra.mxu0 %v1954_v30  ;;  %v958_v30 = vld [vmem:[#allocation7 + $0x1d0] sm:$0xff] }
 0x2b5   : > { %1959 = vmatprep.subr.bf16.mxu0 %v1958_v33  ;;  %v2006_v32 = vpack.c.bf16 %v959_v31, %v958_v30  ;;  %v1163_v30 = vld [vmem:[#allocation11 + $0x68] sm:$0xff] }
 0x2b8   : > { %1961 = vmatpush3.bf16.msra.mxu0 %v1958_v33  ;;  %v1047_v33 = vld [vmem:[#allocation7 + $0x18] sm:$0xff] }
 0x2b9   : > { %1963 = vmatprep.subr.bf16.mxu0 %v1962_v36 }
 0x2bc   : > { %1965 = vmatpush3.bf16.msra.mxu0 %v1962_v36  ;;  %v2010_v36 = vpack.c.bf16 %v1048_v34, %v1047_v33  ;;  %v1165_v33 = vld [vmem:[#allocation11 + $0x78] sm:$0xff] }
 0x2bd   : > { %1967 = vmatprep.subr.bf16.mxu0 %v1966_v40 }
 0x2c0   : > { %1969 = vmatpush3.bf16.msra.mxu0 %v1966_v40  ;;  %v1052_v40 = vld [vmem:[#allocation7 + $0xb8] sm:$0xff] }
 0x2c1   : > { %1971 = vmatprep.subr.bf16.mxu0 %v1970_v42  ;;  %v2018_v41 = vpack.c.bf16 %v1052_v40, %v1051_v39 }
 0x2c4   : > { %1973 = vmatpush3.bf16.msra.mxu0 %v1970_v42  ;;  %v1053_v42 = vld [vmem:[#allocation7 + $0xd8] sm:$0xff] }
 0x2c5   : > { %1975 = vmatprep.subr.bf16.mxu0 %v1974_v45  ;;  %v2022_v44 = vpack.c.bf16 %v1054_v43, %v1053_v42 }
 0x2c8   : > { %1977 = vmatpush3.bf16.msra.mxu0 %v1974_v45  ;;  %v1055_v45 = vld [vmem:[#allocation7 + $0x118] sm:$0xff] }
 0x2c9   : > { %2011 = vmatprep.subr.bf16.mxu0 %v2010_v36  ;;  %v2026_v47 = vpack.c.bf16 %v1056_v46, %v1055_v45 }
 0x37e   : > { %v1677_v20 = vpop.f32.mrb[2].mxu0 }
 0x37f   : > { %v696_v21 = vpop.f32.mrb[3].mxu0  ;;  %v702_v22 = vadd.f32 %v1677_v20, %v1425_v19 }
 0x380   : > { %v697_v23 = vadd.f32 %v1425_v19, %v696_v21  ;;  %v400_v19 = vld [vmem:[%s2730_s22 + $0x8] sm:$0xff] }
 0x381   : > { %v708_v25 = vmul.f32 0.2, %v702_v22  ;;  %vm706_vm5 = vcmp.gt.f32.partialorder %v702_v22, 0.0 }
 0x382   : > { %vm705_vm4 = vcmp.gt.f32.partialorder %v697_v23, 0.0  ;;  %v707_v24 = vmul.f32 0.2, %v697_v23 }
 0x383   : > { %v710_v27 = vsel %vm706_vm5, %v702_v22, %v708_v25  ;;  %v401_v22 = vld [vmem:[%s2730_s22 + $0x18] sm:$0xff] }
 0x384   : > { %v709_v26 = vsel %vm705_vm4, %v697_v23, %v707_v24 }
 0x385   : > { %819 = vmatmul.mubr.f32.vlgmr.msra.gmra.mrb[2].mxu1 %v709_v26 }
 0x386   : > { %824 = vmatprep.mubr.f32.mxu1 %v2441_v12  ;;  %1981 = vmatpush3.bf16.msra.mxu1 %v1978_v49  ;;  %v1058_v49 = vld [vmem:[#allocation7 + $0x178] sm:$0xff] }
 0x387   : > { %1983 = vmatprep.subr.bf16.mxu1 %v1982_v51  ;;  %v2030_v50 = vpack.c.bf16 %v1058_v49, %v1057_v48 }
 0x389   : > { %825 = vmatmul.mubr.f32.gmra.mrb[4].mxu1 %v710_v27  ;;  %v956_v27 = vld [vmem:[#allocation7 + $0x190] sm:$0xff] }
 0x38a   : > { %1985 = vmatpush3.bf16.msra.mxu1 %v1982_v51  ;;  %v2002_v29 = vpack.c.bf16 %v957_v28, %v956_v27  ;;  %v1426_v51 = vld [vmem:[%s2856_s6 + $0x5] ss:$0 sm:$0xff] }
 0x38b   : > { %1987 = vmatprep.subr.bf16.mxu1 %v1986_v54 }
 0x38e   : > { %1989 = vmatpush3.bf16.msra.mxu1 %v1986_v54 }
 0x38f   : > { %1991 = vmatprep.subr.bf16.mxu1 %v1990_v57 }
 0x392   : > { %1993 = vmatpush3.bf16.msra.mxu1 %v1990_v57 }
 0x393   : > { %1995 = vmatprep.subr.bf16.mxu1 %v1994_v60 }
 0x396   : > { %1997 = vmatpush3.bf16.msra.mxu1 %v1994_v60  ;;  %v1059_v60 = vld [vmem:[#allocation7 + $0x198] sm:$0xff] }
 0x397   : > { %1999 = vmatprep.subr.bf16.mxu1 %v1998_v63  ;;  %v2034_v62 = vpack.c.bf16 %v1060_v61, %v1059_v60 }
 0x39a   : > { %2001 = vmatpush3.bf16.msra.mxu1 %v1998_v63  ;;  %v1061_v63 = vld [vmem:[#allocation7 + $0x1d8] sm:$0xff] }
 0x39b   : > { %2003 = vmatprep.subr.bf16.mxu1 %v2002_v29  ;;  %v2038_v1 = vpack.c.bf16 %v1062_v0, %v1061_v63 }
 0x39e   : > { %2005 = vmatpush3.bf16.msra.mxu1 %v2002_v29  ;;  %v1162_v29 = vld [vmem:[#allocation11 + $0x60] sm:$0xff] }
 0x39f   : > { %2007 = vmatprep.subr.bf16.mxu1 %v2006_v32  ;;  %v2066_v31 = vpack.c.bf16 %v1163_v30, %v1162_v29 }
 0x3a2   : > { %2009 = vmatpush3.bf16.msra.mxu1 %v2006_v32  ;;  %v1164_v32 = vld [vmem:[#allocation11 + $0x70] sm:$0xff] }
 0x3a3   : > { %v2070_v34 = vpack.c.bf16 %v1165_v33, %v1164_v32 }
 0x458   : > { %v820_v7 = vpop.f32.mrb[2].mxu1 }
 0x459   : > { %v821_v8 = vadd.f32 %v820_v7, %v747_v5  ;;  %v822_v9 = vpop.f32.mrb[3].mxu1 }
 0x45a   : > { %v823_v10 = vadd.f32 %v822_v9, %v751_v6  ;;  %v1155_v9 = vld [vmem:[#allocation11 + $0x28] sm:$0xff] }
 0x45b   : > { %1251 = vst [vmem:[%s2763_s14 + $0x10] sm:$0xff] %v821_v8 }
 0x45c   : > { %v831_v11 = vmul.f32 0.5, %v823_v10  ;;  %1253 = vst [vmem:[%s2763_s14 + $0x18] sm:$0xff] %v823_v10  ;;  %v826_v12 = vpop.f32.mrb[4].mxu1 }
 0x45d   : > { %v827_v13 = vadd.f32 %v826_v12, %v747_v5  ;;  %v828_v14 = vpop.f32.mrb[5].mxu1  ;;  %v2042_v5 = vpack.c.bf16 %v1151_v3, %v1150_v2  ;;  %v1157_v12 = vld [vmem:[#allocation11 + $0x38] sm:$0xff] }
 0x45e   : > { %v833_v15 = vmul.f32 1.442695, %v831_v11  ;;  %v829_v16 = vadd.f32 %v828_v14, %v751_v6  ;;  %v1153_v6 = vld [vmem:[#allocation11 + $0x18] sm:$0xff]  ;;  %v1156_v11 = vld [vmem:[#allocation11 + $0x30] sm:$0xff]  ;;  %v1158_v14 = vld [vmem:[#allocation11 + $0x40] sm:$0xff] }
 0x45f   : > { %1252 = vst [vmem:[%s2763_s14 + $0x30] sm:$0xff] %v827_v13  ;;  %v2046_v7 = vpack.c.bf16 %v1153_v6, %v1152_v4  ;;  %2043 = vmatprep.subr.bf16.mxu1 %v2042_v5 }
 0x460   : > { %2175 = vpow2.f32 %v833_v15  ;;  %v832_v17 = vmul.f32 0.5, %v829_v16  ;;  %1254 = vst [vmem:[%s2763_s14 + $0x38] sm:$0xff] %v829_v16  ;;  %v1159_v15 = vld [vmem:[#allocation11 + $0x48] sm:$0xff] }
 0x461   : > { %v2058_v16 = vpack.c.bf16 %v1159_v15, %v1158_v14 }
 0x462   : > { %v835_v18 = vmul.f32 1.442695, %v832_v17  ;;  %v1160_v17 = vld [vmem:[#allocation11 + $0x50] sm:$0xff] }
 0x464   : > { %2177 = vpow2.f32 %v835_v18  ;;  %v1161_v18 = vld [vmem:[#allocation11 + $0x58] sm:$0xff] }
 0x46a   : > { %v2176_v20 = vpop.eup %2175 }
 0x46b   : > { %v837_v21 = vmul.f32 %v2176_v20, %v400_v19  ;;  %v2062_v19 = vpack.c.bf16 %v1161_v18, %v1160_v17  ;;  %v1427_v20 = vld [vmem:[%s2856_s6 + $0x6] ss:$0 sm:$0xff] }
 0x46d   : > { %v839_v23 = vadd.f32 %v837_v21, %v821_v8  ;;  %v1154_v8 = vld [vmem:[#allocation11 + $0x20] sm:$0xff] }
 0x46e   : > { %v2178_v24 = vpop.eup %2177  ;;  %v2050_v10 = vpack.c.bf16 %v1155_v9, %v1154_v8 }
 0x46f   : > { %1710 = vmatprep.mubr.f32.mxu0 %v839_v23  ;;  %1249 = vst [vmem:[%s2763_s14 + $0x8] sm:$0xff] %v839_v23  ;;  %v838_v25 = vmul.f32 %v2178_v24, %v401_v22 }
 0x471   : > { %v840_v26 = vadd.f32 %v838_v25, %v827_v13  ;;  %v2054_v13 = vpack.c.bf16 %v1157_v12, %v1156_v11 }
 0x473   : > { %1711 = vmatmul.mubr.f32.vlgmr.msra.gmra.mrb[4].mxu0 %v840_v26  ;;  %1250 = vst [vmem:[%s2763_s14 + $0x28] sm:$0xff] %v840_v26 }
 0x474   : > { %2013 = vmatpush3.bf16.msra.mxu0 %v2010_v36 }
 0x475   : > { %2015 = vmatprep.subr.bf16.mxu0 %v2014_v38 }
 0x478   : > { %2017 = vmatpush3.bf16.msra.mxu0 %v2014_v38 }
 0x479   : > { %2019 = vmatprep.subr.bf16.mxu0 %v2018_v41 }
 0x47c   : > { %2021 = vmatpush3.bf16.msra.mxu0 %v2018_v41 }
 0x47d   : > { %2023 = vmatprep.subr.bf16.mxu0 %v2022_v44 }
 0x480   : > { %2025 = vmatpush3.bf16.msra.mxu0 %v2022_v44  ;;  %v1429_v44 = vld [vmem:[%s2856_s6 + $0x8] ss:$0 sm:$0xff] }
 0x481   : > { %2027 = vmatprep.subr.bf16.mxu0 %v2026_v47 }
 0x484   : > { %2029 = vmatpush3.bf16.msra.mxu0 %v2026_v47 }
 0x485   : > { %2031 = vmatprep.subr.bf16.mxu0 %v2030_v50 }
 0x488   : > { %2033 = vmatpush3.bf16.msra.mxu0 %v2030_v50 }
 0x489   : > { %2035 = vmatprep.subr.bf16.mxu0 %v2034_v62 }
 0x48c   : > { %2037 = vmatpush3.bf16.msra.mxu0 %v2034_v62 }
 0x48d   : > { %2039 = vmatprep.subr.bf16.mxu0 %v2038_v1 }
 0x490   : > { %2041 = vmatpush3.bf16.msra.mxu0 %v2038_v1 }
 0x546   : > { %v1712_v52 = vpop.f32.mrb[4].mxu0 }
 0x547   : > { %v935_v53 = vadd.f32 %v1712_v52, %v1426_v51  ;;  %v929_v54 = vpop.f32.mrb[5].mxu0 }
 0x548   : > { %v930_v55 = vadd.f32 %v1426_v51, %v929_v54 }
 0x549   : > { %v941_v56 = vmul.f32 0.2, %v935_v53  ;;  %vm939_vm6 = vcmp.gt.f32.partialorder %v935_v53, 0.0 }
 0x54a   : > { %v940_v57 = vmul.f32 0.2, %v930_v55  ;;  %vm938_vm7 = vcmp.gt.f32.partialorder %v930_v55, 0.0 }
 0x54b   : > { %v943_v59 = vsel %vm939_vm6, %v935_v53, %v941_v56 }
 0x54c   : > { %v942_v58 = vsel %vm938_vm7, %v930_v55, %v940_v57 }
 0x54d   : > { %1745 = vmatprep.mubr.f32.mxu1 %v942_v58 }
 0x54e   : > { %1746 = vmatmul.mubr.f32.vlgmr.msra.gmra.mrb[6].mxu1 %v943_v59 }
 0x54f   : > { %2045 = vmatpush3.bf16.msra.mxu1 %v2042_v5 }
 0x550   : > { %2047 = vmatprep.subr.bf16.mxu1 %v2046_v7 }
 0x553   : > { %2049 = vmatpush3.bf16.msra.mxu1 %v2046_v7 }
 0x554   : > { %2051 = vmatprep.subr.bf16.mxu1 %v2050_v10 }
 0x557   : > { %2053 = vmatpush3.bf16.msra.mxu1 %v2050_v10 }
 0x558   : > { %2055 = vmatprep.subr.bf16.mxu1 %v2054_v13 }
 0x55b   : > { %2057 = vmatpush3.bf16.msra.mxu1 %v2054_v13 }
 0x55c   : > { %2059 = vmatprep.subr.bf16.mxu1 %v2058_v16 }
 0x55f   : > { %2061 = vmatpush3.bf16.msra.mxu1 %v2058_v16 }
 0x560   : > { %2063 = vmatprep.subr.bf16.mxu1 %v2062_v19 }
 0x563   : > { %2065 = vmatpush3.bf16.msra.mxu1 %v2062_v19 }
 0x564   : > { %2067 = vmatprep.subr.bf16.mxu1 %v2066_v31 }
 0x567   : > { %2069 = vmatpush3.bf16.msra.mxu1 %v2066_v31 }
 0x568   : > { %2071 = vmatprep.subr.bf16.mxu1 %v2070_v34 }
 0x56b   : > { %2073 = vmatpush3.bf16.msra.mxu1 %v2070_v34 }
 0x621   : > { %v1747_v21 = vpop.f32.mrb[6].mxu1 }
 0x622   : > { %v1038_v22 = vadd.f32 %v1747_v21, %v1427_v20  ;;  %v1032_v23 = vpop.f32.mrb[7].mxu1 }
 0x623   : > { %v1033_v24 = vadd.f32 %v1427_v20, %v1032_v23 }
 0x624   : > { %v1044_v25 = vmul.f32 0.2, %v1038_v22  ;;  %vm1042_vm8 = vcmp.gt.f32.partialorder %v1038_v22, 0.0 }
 0x625   : > { %v1043_v26 = vmul.f32 0.2, %v1033_v24  ;;  %vm1041_vm9 = vcmp.gt.f32.partialorder %v1033_v24, 0.0 }
 0x626   : > { %v1046_v28 = vsel %vm1042_vm8, %v1038_v22, %v1044_v25 }
 0x627   : > { %v1045_v27 = vsel %vm1041_vm9, %v1033_v24, %v1043_v26 }
 0x628   : > { %1780 = vmatprep.mubr.f32.mxu0 %v1045_v27 }
 0x629   : > { %1781 = vmatmul.mubr.f32.vlgmr.msra.gmra.mrb[6].mxu0 %v1046_v28 }
 0x6fc   : > { %v1782_v36 = vpop.f32.mrb[6].mxu0 }
 0x6fd   : > { %v1141_v37 = vadd.f32 %v1782_v36, %v1428_v35  ;;  %v1135_v38 = vpop.f32.mrb[7].mxu0 }
 0x6fe   : > { %v1136_v39 = vadd.f32 %v1428_v35, %v1135_v38 }
 0x6ff   : > { %v1147_v40 = vmul.f32 0.2, %v1141_v37  ;;  %vm1145_vm10 = vcmp.gt.f32.partialorder %v1141_v37, 0.0 }
 0x700   : > { %v1146_v41 = vmul.f32 0.2, %v1136_v39  ;;  %vm1144_vm11 = vcmp.gt.f32.partialorder %v1136_v39, 0.0 }
 0x701   : > { %v1149_v43 = vsel %vm1145_vm10, %v1141_v37, %v1147_v40 }
 0x702   : > { %v1148_v42 = vsel %vm1144_vm11, %v1136_v39, %v1146_v41 }
 0x703   : > { %1815 = vmatprep.mubr.f32.mxu1 %v1148_v42 }
 0x704   : > { %1816 = vmatmul.mubr.f32.vlgmr.msra.gmra.mrb[8].mxu1 %v1149_v43 }
 0x7d5   : > { %1262 = sbr.rel (!%p2893_p5) target bundleno = 2040 (0x7f8), region = 76 }
 0x7d7   : > { %v1817_v45 = vpop.f32.mrb[8].mxu1 }
 0x7d8   : > { %v1244_v46 = vadd.f32 %v1817_v45, %v1429_v44  ;;  %v1238_v47 = vpop.f32.mrb[9].mxu1 }
 0x7d9   : > { %v1239_v48 = vadd.f32 %v1429_v44, %v1238_v47 }
 0x7da   : > { %1248 = vst [vmem:[%s2763_s14 + $0x20] sm:$0xff] %v1244_v46 }
 0x7db   : > { %1247 = vst [vmem:[%s2763_s14] sm:$0xff] %v1239_v48 }
 0x7dc   : > { %s2905_s19 = smov (!%p1265_p6, %s1264_s19), 2 }
 0x7dd   : > { %s2791_s30 = sshll.u32 %s2905_s19, 9 }
 0x7de   : > { %s1270_s20 = ssub.s32 1024, %s2791_s30 }
 0x7df   : > { %1271 = vsyncadd %s1256_s12, %s1270_s20  ;;  %p1434_p11 = scmp.ne.s32.totalorder %s2791_s30, 0  ;;  %s1446_s13 = sshll.u32 %s2506_s28, 10 }
 0x7e0   : > { %s2801_s9 = scalar_lea.hbm %s2857_s7, %s1446_s13  ;;  %s1277_s18 = sshll.u32 %s2763_s14, 4  ;;  %s2804_s18 = int_to_ptr.vmem [resolvable:$true] %s1277_s18 }
 0x7e1   : > { %s2347_s16 = scalar_lea.vmem %s2804_s18, %s2791_s30  ;;  %s2442_s23 = smov [#allocation13]  }
 0x7e2   : > { %p2348_p13 = scmp.ne.s32.totalorder %s2804_s18, %s2347_s16  ;;  %s2351_s29 = sshll.u32 %s2442_s23, 4  ;;  %s2352_s29 = int_to_ptr.vmem [resolvable:$false] %s2351_s29 }
 0x7e3   : > { %s2353_s28 = scalar_lea.vmem %s2352_s29, 2048  ;;  %p2354_p7 = scmp.lt.s32.totalorder %s2804_s18, %s2352_s29 }
 0x7e4   : > { %p2349_p0 = pnand %p2348_p13, %p1434_p11  ;;  %p2355_p2 = scmp.lt.s32.totalorder %s2353_s28, %s2347_s16 }
 0x7e6   : > { %p2350_p12 = pneg %p2349_p0  ;;  %p2356_p8 = por %p2355_p2, %p2354_p7 }
 0x7e8   : > { %p2357_p9 = pnand %p2356_p8, %p2350_p12 }
 0x7ea   : > { %2360 = shalt.err (!%p2357_p9)
}
 0x7eb   : > { %s2361_s14 = scalar_lea.hbm %s2801_s9, %s2791_s30  ;;  %s2365_s8 = scalar_lea.hbm %s2857_s7, 1536 }
 0x7ec   : > { %p2362_p10 = scmp.ne.s32.totalorder %s2801_s9, %s2361_s14  ;;  %p2366_p5 = scmp.lt.u32.totalorder %s2801_s9, %s2857_s7 }
 0x7ed   : > { %p2367_p6 = scmp.lt.u32.totalorder %s2365_s8, %s2361_s14  ;;  %p2369_p0 = scmp.lt.u32.totalorder %s2361_s14, %s2801_s9 }
 0x7ee   : > { %p2363_p1 = pnand %p2362_p10, %p1434_p11 }
 0x7ef   : > { %p2368_p13 = por %p2367_p6, %p2366_p5 }
 0x7f0   : > { %p2364_p4 = pneg %p2363_p1 }
 0x7f1   : > { %p2370_p12 = por %p2369_p0, %p2368_p13 }
 0x7f3   : > { %p2371_p7 = pnand %p2370_p12, %p2364_p4 }
 0x7f5   : > { %2374 = shalt.err (!%p2371_p7)
}
 0x7f6   : > { %s2443_s15 = smov 512   ;;  %s2444_s19 = smov 32  }
 0x7f7   : > { %1283 = dma.vmem_to_hbm [thread:$0]  (%p1434_p11), %s2804_s18, %s2791_s30, %s2801_s9, %s1256_s12, %s2443_s15, %s2443_s15, %s2444_s19  }
 0x7f8 PF: > { %s2894_s20 = sld [smem:[#allocation19_spill]]  ;;  %s2895_s13 = sld [smem:[#allocation22_spill]] }
 0x7fe   : > { %s1292_s1 = sand.u32 1, %s2894_s20   ;;  %p2896_p2 = scmp.ne.s32.totalorder %s2895_s13, 0 }
 0x7ff   : > { %s1293_s24 = scalar_lea.sflag [#allocation4], %s1292_s1 }
 0x800   : > { %p2113_p8 = pnand %p1405_p3, %p2896_p2 }
 0x802   : > { %2408 = dma.done.wait (!%p2113_p8), %s1293_s24, 1024  }
 0x803   : > { %2410 = vsyncadd (!%p2113_p8), %s1293_s24, 4294966272  ;;  %s2897_s27 = sld [smem:[#allocation20_spill]]  ;;  %s2898_s16 = sld [smem:[#allocation21_spill]] }
 0x804   : > { %s2899_s24 = smov %s2417_s25  ;;  %s2900_s25 = smov %s2421_s26 }
 0x809   : > { %p23_p9 = scmp.ge.s32.totalorder %s2897_s27, 4   ;;  %s2901_s26 = smov %s2898_s16 }
 0x80b   :  { %25 = sbr.rel (!%p23_p9) target bundleno = 10 (0xa), region = 113 }
 0x812   :  { %1298 = vsyncpa [#allocation3], 1 }
 0x813   :  { %1300 = vsyncpa [#allocation3 + $0x1], 1 }
 0x814   :  { %1301 = vsyncpa [#allocation6], 1 }
 0x815   :  { %1302 = vsyncpa [#allocation9], 1 }
 0x816   :  { %1303 = vsyncpa [#allocation12], 1 }
 0x817   :  { %1304 = vsyncpa [#allocation4], 1 }
 0x818   :  { %1306 = vsyncpa [#allocation4 + $0x1], 1 }

</bundles_post_ra>
